<compile_context>
chip_gen: v7x
topology: tpu7x:2x2x1
jax: 0.10.0
libtpu: 0.0.40
codegen_flags: <defaults>
</compile_context>

<pallas_src>
import jax
import jax.numpy as jnp
import numpy as np
from jax import lax
from jax.experimental import pallas as pl
from jax.experimental.pallas import tpu as pltpu

KH = KW = 3      # 3x3 conv, stride 1, padding 1 (as in the PyTorch module)
EPS = 1e-5       # nn.BatchNorm2d default


def make_conv_block_kernel(N, H, W, Cin, Cout, MG):
    """Builds the fused two-stage Conv-BN-ReLU kernel (all shapes static)."""
    P = H * W          # pixels per image

    def kernel(x_ref, w1_ref, b1_ref, g1_ref, bt1_ref,
               w2_ref, b2_ref, g2_ref, bt2_ref,
               out_ref, xz1_ref, xz2_ref, taps1_ref, taps2_ref):
        # lane -> w coordinate; masks the taps that cross the left/right image
        # border (the top/bottom border is handled by the zero halo in xz).
        lane = lax.broadcasted_iota(jnp.int32, (1, P), 1)
        w_idx = (lane & (W - 1)) if (W & (W - 1)) == 0 else (lane % W)
        left_ok = w_idx >= 1            # tap reads column w-1
        right_ok = w_idx <= W - 2       # tap reads column w+1

        def stage(x_imgs, xz_ref, taps_ref, w_ref, b_ref, g_ref, bt_ref):
            """One Conv(3x3,pad=1) + BN(train) + ReLU stage.

            x_imgs: list of N values of shape (C, P) (one per image).
            Returns the stage activation as a (Cout, N*P) value.
            """
            C = xz_ref.shape[0]
            # Zero only the halo margins; the interior is rewritten per image.
            xz_ref[:, :MG] = jnp.zeros((C, MG), jnp.float32)
            xz_ref[:, MG + P:] = jnp.zeros((C, MG), jnp.float32)
            for n, x_img in enumerate(x_imgs):
                xz_ref[:, MG:MG + P] = x_img          # 128-aligned lane store
                for t in range(KH * KW):
                    kh, kw = divmod(t, KW)
                    off = (kh - 1) * W + (kw - 1)
                    tap = xz_ref[:, MG + off:MG + off + P]       # (C, P)
                    if kw == 0:                                   # reads w = -1
                        tap = jnp.where(left_ok, tap, 0.0)
                    elif kw == KW - 1:                            # reads w = W
                        tap = jnp.where(right_ok, tap, 0.0)
                    # im2col scratch: rows = (kh, kw, ci), lanes = (n, h*W + w)
                    taps_ref[t * C:(t + 1) * C, n * P:(n + 1) * P] = tap

            # One fat MXU contraction per stage (K = 9*C), f32 accumulation.
            acc = jnp.dot(w_ref[...], taps_ref[...],
                          preferred_element_type=jnp.float32)    # (Cout, N*P)
            # Conv bias (cancels algebraically in BN, kept for numeric fidelity)
            acc = acc + b_ref[...]

            # BatchNorm2d (training): one-pass biased stats over all N*H*W.
            m = float(len(x_imgs) * P)
            s = jnp.sum(acc, axis=1, keepdims=True)               # (Cout, 1)
            ss = jnp.sum(acc * acc, axis=1, keepdims=True)        # (Cout, 1)
            mean = s / m
            var = ss / m - mean * mean
            scale = g_ref[...] * lax.rsqrt(var + EPS)
            shift = bt_ref[...] - mean * scale
            return jnp.maximum(acc * scale + shift, 0.0)          # ReLU

        # Stage 1: consumes the NCHW input (free-reshaped to (N, Cin, H*W)).
        y1 = stage([x_ref[n] for n in range(N)],
                   xz1_ref, taps1_ref, w1_ref, b1_ref, g1_ref, bt1_ref)
        # Stage 2: stage-1 activation stays on chip (no HBM round trip).
        y2 = stage([y1[:, n * P:(n + 1) * P] for n in range(N)],
                   xz2_ref, taps2_ref, w2_ref, b2_ref, g2_ref, bt2_ref)
        # Lane-dense store, already in channel-major (NCHW) order.
        for n in range(N):
            out_ref[n] = y2[:, n * P:(n + 1) * P]

    return kernel


def conv_block_forward(x_nchw, params):
    """ConvBlock forward; input/output are NCHW exactly like PyTorch."""
    N, Cin, H, W = x_nchw.shape
    Cout = params["w1"].shape[0]
    P = H * W
    MG = max(128, W + 1)        # zero margin in the line buffer (>= W+1)

    # Free reshapes only -- no transposes / jnp.pad on the activation path.
    x = x_nchw.reshape(N, Cin, P)
    # PyTorch OIHW weights -> (Cout, 9*C), matching im2col row order (kh,kw,ci).
    w1 = jnp.transpose(params["w1"], (0, 2, 3, 1)).reshape(Cout, KH * KW * Cin)
    w2 = jnp.transpose(params["w2"], (0, 2, 3, 1)).reshape(Cout, KH * KW * Cout)
    col = lambda v: v.reshape(-1, 1)                      # (C,) -> (C, 1)
    inputs = (x, w1, col(params["b1"]), col(params["g1"]), col(params["bt1"]),
              w2, col(params["b2"]), col(params["g2"]), col(params["bt2"]))

    def full(a):    # whole-array block (block_shape == array shape is legal)
        return pl.BlockSpec(a.shape, lambda i, nd=a.ndim: (0,) * nd)

    out = pl.pallas_call(
        make_conv_block_kernel(N, H, W, Cin, Cout, MG),
        out_shape=jax.ShapeDtypeStruct((N, Cout, P), jnp.float32),
        grid=(1,),
        in_specs=[full(a) for a in inputs],
        out_specs=pl.BlockSpec((N, Cout, P), lambda i: (0, 0, 0)),
        scratch_shapes=[
            pltpu.VMEM((Cin, P + 2 * MG), jnp.float32),        # stage-1 halo buf
            pltpu.VMEM((Cout, P + 2 * MG), jnp.float32),       # stage-2 halo buf
            pltpu.VMEM((KH * KW * Cin, N * P), jnp.float32),   # stage-1 im2col
            pltpu.VMEM((KH * KW * Cout, N * P), jnp.float32),  # stage-2 im2col
        ],
        compiler_params=pltpu.CompilerParams(
            dimension_semantics=("arbitrary",)),
    )(*inputs)
    return out.reshape(N, Cout, H, W)


# ---------------- pure-JAX reference for verification ----------------
def ref_forward(x_nchw, p):
    def stage(x, w, b, g, beta):
        y = lax.conv_general_dilated(
            x, w, window_strides=(1, 1), padding=((1, 1), (1, 1)),
            dimension_numbers=("NCHW", "OIHW", "NCHW"))
        y = y + b.reshape(1, -1, 1, 1)
        mean = y.mean(axis=(0, 2, 3), keepdims=True)
        var = ((y - mean) ** 2).mean(axis=(0, 2, 3), keepdims=True)
        y = (y - mean) * lax.rsqrt(var + EPS) * g.reshape(1, -1, 1, 1) \
            + beta.reshape(1, -1, 1, 1)
        return jnp.maximum(y, 0.0)

    h = stage(x_nchw, p["w1"], p["b1"], p["g1"], p["bt1"])
    return stage(h, p["w2"], p["b2"], p["g2"], p["bt2"])


def init_params(key, cin, cout):
    ks = jax.random.split(key, 4)
    return {
        # PyTorch-native layouts: conv weights OIHW, per-channel vectors (C,)
        "w1": jax.random.normal(ks[0], (cout, cin, KH, KW), jnp.float32) * 0.1,
        "b1": jax.random.normal(ks[2], (cout,), jnp.float32) * 0.1,
        "g1": jnp.ones((cout,), jnp.float32),     # BN weight init
        "bt1": jnp.zeros((cout,), jnp.float32),   # BN bias init
        "w2": jax.random.normal(ks[1], (cout, cout, KH, KW), jnp.float32) * 0.1,
        "b2": jax.random.normal(ks[3], (cout,), jnp.float32) * 0.1,
        "g2": jnp.ones((cout,), jnp.float32),
        "bt2": jnp.zeros((cout,), jnp.float32),
    }


if __name__ == "__main__":
    key = jax.random.PRNGKey(0)
    kx, kp = jax.random.split(key)

    N, Cin, Cout, H, W = 2, 4, 8, 16, 16
    x = jax.random.normal(kx, (N, Cin, H, W), jnp.float32)   # NCHW, as PyTorch
    params = init_params(kp, Cin, Cout)

    out = jax.block_until_ready(jax.jit(conv_block_forward)(x, params))
    ref = jax.block_until_ready(ref_forward(x, params))

    assert out.shape == (N, Cout, H, W), out.shape
    np.testing.assert_allclose(np.asarray(out), np.asarray(ref),
                               rtol=2e-4, atol=2e-4)
    print("KERNEL_OK")
</pallas_src>

<mosaic_0001>
module attributes {stable_mosaic.version = 11 : i64} {
  func.func @kernel(%arg0: i32, %arg1: memref<2x4x256xf32, #tpu.memory_space<vmem>>, %arg2: memref<8x36xf32, #tpu.memory_space<vmem>>, %arg3: memref<8x1xf32, #tpu.memory_space<vmem>>, %arg4: memref<8x1xf32, #tpu.memory_space<vmem>>, %arg5: memref<8x1xf32, #tpu.memory_space<vmem>>, %arg6: memref<8x72xf32, #tpu.memory_space<vmem>>, %arg7: memref<8x1xf32, #tpu.memory_space<vmem>>, %arg8: memref<8x1xf32, #tpu.memory_space<vmem>>, %arg9: memref<8x1xf32, #tpu.memory_space<vmem>>, %arg10: memref<2x8x256xf32, #tpu.memory_space<vmem>>, %arg11: memref<4x512xf32, #tpu.memory_space<vmem>>, %arg12: memref<8x512xf32, #tpu.memory_space<vmem>>, %arg13: memref<36x512xf32, #tpu.memory_space<vmem>>, %arg14: memref<72x512xf32, #tpu.memory_space<vmem>>) attributes {dimension_semantics = [#tpu.dimension_semantics<arbitrary>], iteration_bounds = array<i64: 1>, scalar_prefetch = 0 : i64, scratch_operands = 4 : i64, tpu.core_type = #tpu.core_type<tc>, window_params = [{pipeline_mode = #tpu.pipeline_mode<synchronous>, transform_indices = @transform_0, window_bounds = array<i64: 2, 4, 256>}, {pipeline_mode = #tpu.pipeline_mode<synchronous>, transform_indices = @transform_1, window_bounds = array<i64: 8, 36>}, {pipeline_mode = #tpu.pipeline_mode<synchronous>, transform_indices = @transform_2, window_bounds = array<i64: 8, 1>}, {pipeline_mode = #tpu.pipeline_mode<synchronous>, transform_indices = @transform_3, window_bounds = array<i64: 8, 1>}, {pipeline_mode = #tpu.pipeline_mode<synchronous>, transform_indices = @transform_4, window_bounds = array<i64: 8, 1>}, {pipeline_mode = #tpu.pipeline_mode<synchronous>, transform_indices = @transform_5, window_bounds = array<i64: 8, 72>}, {pipeline_mode = #tpu.pipeline_mode<synchronous>, transform_indices = @transform_6, window_bounds = array<i64: 8, 1>}, {pipeline_mode = #tpu.pipeline_mode<synchronous>, transform_indices = @transform_7, window_bounds = array<i64: 8, 1>}, {pipeline_mode = #tpu.pipeline_mode<synchronous>, transform_indices = @transform_8, window_bounds = array<i64: 8, 1>}, {pipeline_mode = #tpu.pipeline_mode<synchronous>, transform_indices = @transform_9, window_bounds = array<i64: 2, 8, 256>}]} {
    %0 = tpu.iota {dimensions = array<i32: 1>} : vector<1x256xi32>
    %c15_i32 = arith.constant 15 : i32
    %1 = vector.broadcast %c15_i32 : i32 to vector<1x256xi32>
    %2 = arith.andi %0, %1 : vector<1x256xi32>
    %c1_i32 = arith.constant 1 : i32
    %3 = vector.broadcast %c1_i32 : i32 to vector<1x256xi32>
    %4 = arith.cmpi sge, %2, %3 : vector<1x256xi32>
    %c14_i32 = arith.constant 14 : i32
    %5 = vector.broadcast %c14_i32 : i32 to vector<1x256xi32>
    %6 = arith.cmpi sle, %2, %5 : vector<1x256xi32>
    %c0 = arith.constant 0 : index
    %c0_0 = arith.constant 0 : index
    %c0_1 = arith.constant 0 : index
    %7 = vector.load %arg1[%c0, %c0_0, %c0_1] : memref<2x4x256xf32, #tpu.memory_space<vmem>>, vector<1x4x256xf32>
    %8 = vector.shape_cast %7 : vector<1x4x256xf32> to vector<4x256xf32>
    %c1 = arith.constant 1 : index
    %c0_2 = arith.constant 0 : index
    %c0_3 = arith.constant 0 : index
    %9 = vector.load %arg1[%c1, %c0_2, %c0_3] : memref<2x4x256xf32, #tpu.memory_space<vmem>>, vector<1x4x256xf32>
    %10 = vector.shape_cast %9 : vector<1x4x256xf32> to vector<4x256xf32>
    %cst = arith.constant 0.000000e+00 : f32
    %11 = vector.broadcast %cst : f32 to vector<4x128xf32>
    %c0_4 = arith.constant 0 : index
    %c0_5 = arith.constant 0 : index
    %12 = vector.load %arg11[%c0_4, %c0_5] : memref<4x512xf32, #tpu.memory_space<vmem>>, vector<4x128xf32>
    tpu.vector_store %arg11[%c0_4, %c0_5], %11 {strides = array<i32>} : memref<4x512xf32, #tpu.memory_space<vmem>>, vector<4x128xf32>,
    %cst_6 = arith.constant 0.000000e+00 : f32
    %13 = vector.broadcast %cst_6 : f32 to vector<4x128xf32>
    %c0_7 = arith.constant 0 : index
    %c384 = arith.constant 384 : index
    %14 = vector.load %arg11[%c0_7, %c384] : memref<4x512xf32, #tpu.memory_space<vmem>>, vector<4x128xf32>
    tpu.vector_store %arg11[%c0_7, %c384], %13 {strides = array<i32>} : memref<4x512xf32, #tpu.memory_space<vmem>>, vector<4x128xf32>,
    %c0_8 = arith.constant 0 : index
    %c128 = arith.constant 128 : index
    %15 = vector.load %arg11[%c0_8, %c128] : memref<4x512xf32, #tpu.memory_space<vmem>>, vector<4x256xf32>
    tpu.vector_store %arg11[%c0_8, %c128], %8 {strides = array<i32>} : memref<4x512xf32, #tpu.memory_space<vmem>>, vector<4x256xf32>,
    %c0_9 = arith.constant 0 : index
    %c111 = arith.constant 111 : index
    %16 = vector.load %arg11[%c0_9, %c111] : memref<4x512xf32, #tpu.memory_space<vmem>>, vector<4x256xf32>
    %cst_10 = arith.constant 0.000000e+00 : f32
    %17 = vector.shape_cast %4 : vector<1x256xi1> to vector<1x256xi1>
    %18 = vector.broadcast %17 : vector<1x256xi1> to vector<4x256xi1>
    %19 = vector.broadcast %cst_10 : f32 to vector<4x256xf32>
    %20 = arith.select %18, %16, %19 : vector<4x256xi1>, vector<4x256xf32>
    %c0_11 = arith.constant 0 : index
    %c0_12 = arith.constant 0 : index
    %21 = vector.load %arg13[%c0_11, %c0_12] : memref<36x512xf32, #tpu.memory_space<vmem>>, vector<4x256xf32>
    tpu.vector_store %arg13[%c0_11, %c0_12], %20 {strides = array<i32>} : memref<36x512xf32, #tpu.memory_space<vmem>>, vector<4x256xf32>,
    %c0_13 = arith.constant 0 : index
    %c112 = arith.constant 112 : index
    %22 = vector.load %arg11[%c0_13, %c112] : memref<4x512xf32, #tpu.memory_space<vmem>>, vector<4x256xf32>
    %c4 = arith.constant 4 : index
    %c0_14 = arith.constant 0 : index
    %23 = vector.load %arg13[%c4, %c0_14] : memref<36x512xf32, #tpu.memory_space<vmem>>, vector<4x256xf32>
    tpu.vector_store %arg13[%c4, %c0_14], %22 {strides = array<i32>} : memref<36x512xf32, #tpu.memory_space<vmem>>, vector<4x256xf32>,
    %c0_15 = arith.constant 0 : index
    %c113 = arith.constant 113 : index
    %24 = vector.load %arg11[%c0_15, %c113] : memref<4x512xf32, #tpu.memory_space<vmem>>, vector<4x256xf32>
    %cst_16 = arith.constant 0.000000e+00 : f32
    %25 = vector.shape_cast %6 : vector<1x256xi1> to vector<1x256xi1>
    %26 = vector.broadcast %25 : vector<1x256xi1> to vector<4x256xi1>
    %27 = vector.broadcast %cst_16 : f32 to vector<4x256xf32>
    %28 = arith.select %26, %24, %27 : vector<4x256xi1>, vector<4x256xf32>
    %c8 = arith.constant 8 : index
    %c0_17 = arith.constant 0 : index
    %29 = vector.load %arg13[%c8, %c0_17] : memref<36x512xf32, #tpu.memory_space<vmem>>, vector<4x256xf32>
    tpu.vector_store %arg13[%c8, %c0_17], %28 {strides = array<i32>} : memref<36x512xf32, #tpu.memory_space<vmem>>, vector<4x256xf32>,
    %c0_18 = arith.constant 0 : index
    %c127 = arith.constant 127 : index
    %30 = vector.load %arg11[%c0_18, %c127] : memref<4x512xf32, #tpu.memory_space<vmem>>, vector<4x256xf32>
    %cst_19 = arith.constant 0.000000e+00 : f32
    %31 = vector.shape_cast %4 : vector<1x256xi1> to vector<1x256xi1>
    %32 = vector.broadcast %31 : vector<1x256xi1> to vector<4x256xi1>
    %33 = vector.broadcast %cst_19 : f32 to vector<4x256xf32>
    %34 = arith.select %32, %30, %33 : vector<4x256xi1>, vector<4x256xf32>
    %c12 = arith.constant 12 : index
    %c0_20 = arith.constant 0 : index
    %35 = vector.load %arg13[%c12, %c0_20] : memref<36x512xf32, #tpu.memory_space<vmem>>, vector<4x256xf32>
    tpu.vector_store %arg13[%c12, %c0_20], %34 {strides = array<i32>} : memref<36x512xf32, #tpu.memory_space<vmem>>, vector<4x256xf32>,
    %c0_21 = arith.constant 0 : index
    %c128_22 = arith.constant 128 : index
    %36 = vector.load %arg11[%c0_21, %c128_22] : memref<4x512xf32, #tpu.memory_space<vmem>>, vector<4x256xf32>
    %c16 = arith.constant 16 : index
    %c0_23 = arith.constant 0 : index
    %37 = vector.load %arg13[%c16, %c0_23] : memref<36x512xf32, #tpu.memory_space<vmem>>, vector<4x256xf32>
    tpu.vector_store %arg13[%c16, %c0_23], %36 {strides = array<i32>} : memref<36x512xf32, #tpu.memory_space<vmem>>, vector<4x256xf32>,
    %c0_24 = arith.constant 0 : index
    %c129 = arith.constant 129 : index
    %38 = vector.load %arg11[%c0_24, %c129] : memref<4x512xf32, #tpu.memory_space<vmem>>, vector<4x256xf32>
    %cst_25 = arith.constant 0.000000e+00 : f32
    %39 = vector.shape_cast %6 : vector<1x256xi1> to vector<1x256xi1>
    %40 = vector.broadcast %39 : vector<1x256xi1> to vector<4x256xi1>
    %41 = vector.broadcast %cst_25 : f32 to vector<4x256xf32>
    %42 = arith.select %40, %38, %41 : vector<4x256xi1>, vector<4x256xf32>
    %c20 = arith.constant 20 : index
    %c0_26 = arith.constant 0 : index
    %43 = vector.load %arg13[%c20, %c0_26] : memref<36x512xf32, #tpu.memory_space<vmem>>, vector<4x256xf32>
    tpu.vector_store %arg13[%c20, %c0_26], %42 {strides = array<i32>} : memref<36x512xf32, #tpu.memory_space<vmem>>, vector<4x256xf32>,
    %c0_27 = arith.constant 0 : index
    %c143 = arith.constant 143 : index
    %44 = vector.load %arg11[%c0_27, %c143] : memref<4x512xf32, #tpu.memory_space<vmem>>, vector<4x256xf32>
    %cst_28 = arith.constant 0.000000e+00 : f32
    %45 = vector.shape_cast %4 : vector<1x256xi1> to vector<1x256xi1>
    %46 = vector.broadcast %45 : vector<1x256xi1> to vector<4x256xi1>
    %47 = vector.broadcast %cst_28 : f32 to vector<4x256xf32>
    %48 = arith.select %46, %44, %47 : vector<4x256xi1>, vector<4x256xf32>
    %c24 = arith.constant 24 : index
    %c0_29 = arith.constant 0 : index
    %49 = vector.load %arg13[%c24, %c0_29] : memref<36x512xf32, #tpu.memory_space<vmem>>, vector<4x256xf32>
    tpu.vector_store %arg13[%c24, %c0_29], %48 {strides = array<i32>} : memref<36x512xf32, #tpu.memory_space<vmem>>, vector<4x256xf32>,
    %c0_30 = arith.constant 0 : index
    %c144 = arith.constant 144 : index
    %50 = vector.load %arg11[%c0_30, %c144] : memref<4x512xf32, #tpu.memory_space<vmem>>, vector<4x256xf32>
    %c28 = arith.constant 28 : index
    %c0_31 = arith.constant 0 : index
    %51 = vector.load %arg13[%c28, %c0_31] : memref<36x512xf32, #tpu.memory_space<vmem>>, vector<4x256xf32>
    tpu.vector_store %arg13[%c28, %c0_31], %50 {strides = array<i32>} : memref<36x512xf32, #tpu.memory_space<vmem>>, vector<4x256xf32>,
    %c0_32 = arith.constant 0 : index
    %c145 = arith.constant 145 : index
    %52 = vector.load %arg11[%c0_32, %c145] : memref<4x512xf32, #tpu.memory_space<vmem>>, vector<4x256xf32>
    %cst_33 = arith.constant 0.000000e+00 : f32
    %53 = vector.shape_cast %6 : vector<1x256xi1> to vector<1x256xi1>
    %54 = vector.broadcast %53 : vector<1x256xi1> to vector<4x256xi1>
    %55 = vector.broadcast %cst_33 : f32 to vector<4x256xf32>
    %56 = arith.select %54, %52, %55 : vector<4x256xi1>, vector<4x256xf32>
    %c32 = arith.constant 32 : index
    %c0_34 = arith.constant 0 : index
    %57 = vector.load %arg13[%c32, %c0_34] : memref<36x512xf32, #tpu.memory_space<vmem>>, vector<4x256xf32>
    tpu.vector_store %arg13[%c32, %c0_34], %56 {strides = array<i32>} : memref<36x512xf32, #tpu.memory_space<vmem>>, vector<4x256xf32>,
    %c0_35 = arith.constant 0 : index
    %c128_36 = arith.constant 128 : index
    %58 = vector.load %arg11[%c0_35, %c128_36] : memref<4x512xf32, #tpu.memory_space<vmem>>, vector<4x256xf32>
    tpu.vector_store %arg11[%c0_35, %c128_36], %10 {strides = array<i32>} : memref<4x512xf32, #tpu.memory_space<vmem>>, vector<4x256xf32>,
    %c0_37 = arith.constant 0 : index
    %c111_38 = arith.constant 111 : index
    %59 = vector.load %arg11[%c0_37, %c111_38] : memref<4x512xf32, #tpu.memory_space<vmem>>, vector<4x256xf32>
    %cst_39 = arith.constant 0.000000e+00 : f32
    %60 = vector.shape_cast %4 : vector<1x256xi1> to vector<1x256xi1>
    %61 = vector.broadcast %60 : vector<1x256xi1> to vector<4x256xi1>
    %62 = vector.broadcast %cst_39 : f32 to vector<4x256xf32>
    %63 = arith.select %61, %59, %62 : vector<4x256xi1>, vector<4x256xf32>
    %c0_40 = arith.constant 0 : index
    %c256 = arith.constant 256 : index
    %64 = vector.load %arg13[%c0_40, %c256] : memref<36x512xf32, #tpu.memory_space<vmem>>, vector<4x256xf32>
    tpu.vector_store %arg13[%c0_40, %c256], %63 {strides = array<i32>} : memref<36x512xf32, #tpu.memory_space<vmem>>, vector<4x256xf32>,
    %c0_41 = arith.constant 0 : index
    %c112_42 = arith.constant 112 : index
    %65 = vector.load %arg11[%c0_41, %c112_42] : memref<4x512xf32, #tpu.memory_space<vmem>>, vector<4x256xf32>
    %c4_43 = arith.constant 4 : index
    %c256_44 = arith.constant 256 : index
    %66 = vector.load %arg13[%c4_43, %c256_44] : memref<36x512xf32, #tpu.memory_space<vmem>>, vector<4x256xf32>
    tpu.vector_store %arg13[%c4_43, %c256_44], %65 {strides = array<i32>} : memref<36x512xf32, #tpu.memory_space<vmem>>, vector<4x256xf32>,
    %c0_45 = arith.constant 0 : index
    %c113_46 = arith.constant 113 : index
    %67 = vector.load %arg11[%c0_45, %c113_46] : memref<4x512xf32, #tpu.memory_space<vmem>>, vector<4x256xf32>
    %cst_47 = arith.constant 0.000000e+00 : f32
    %68 = vector.shape_cast %6 : vector<1x256xi1> to vector<1x256xi1>
    %69 = vector.broadcast %68 : vector<1x256xi1> to vector<4x256xi1>
    %70 = vector.broadcast %cst_47 : f32 to vector<4x256xf32>
    %71 = arith.select %69, %67, %70 : vector<4x256xi1>, vector<4x256xf32>
    %c8_48 = arith.constant 8 : index
    %c256_49 = arith.constant 256 : index
    %72 = vector.load %arg13[%c8_48, %c256_49] : memref<36x512xf32, #tpu.memory_space<vmem>>, vector<4x256xf32>
    tpu.vector_store %arg13[%c8_48, %c256_49], %71 {strides = array<i32>} : memref<36x512xf32, #tpu.memory_space<vmem>>, vector<4x256xf32>,
    %c0_50 = arith.constant 0 : index
    %c127_51 = arith.constant 127 : index
    %73 = vector.load %arg11[%c0_50, %c127_51] : memref<4x512xf32, #tpu.memory_space<vmem>>, vector<4x256xf32>
    %cst_52 = arith.constant 0.000000e+00 : f32
    %74 = vector.shape_cast %4 : vector<1x256xi1> to vector<1x256xi1>
    %75 = vector.broadcast %74 : vector<1x256xi1> to vector<4x256xi1>
    %76 = vector.broadcast %cst_52 : f32 to vector<4x256xf32>
    %77 = arith.select %75, %73, %76 : vector<4x256xi1>, vector<4x256xf32>
    %c12_53 = arith.constant 12 : index
    %c256_54 = arith.constant 256 : index
    %78 = vector.load %arg13[%c12_53, %c256_54] : memref<36x512xf32, #tpu.memory_space<vmem>>, vector<4x256xf32>
    tpu.vector_store %arg13[%c12_53, %c256_54], %77 {strides = array<i32>} : memref<36x512xf32, #tpu.memory_space<vmem>>, vector<4x256xf32>,
    %c0_55 = arith.constant 0 : index
    %c128_56 = arith.constant 128 : index
    %79 = vector.load %arg11[%c0_55, %c128_56] : memref<4x512xf32, #tpu.memory_space<vmem>>, vector<4x256xf32>
    %c16_57 = arith.constant 16 : index
    %c256_58 = arith.constant 256 : index
    %80 = vector.load %arg13[%c16_57, %c256_58] : memref<36x512xf32, #tpu.memory_space<vmem>>, vector<4x256xf32>
    tpu.vector_store %arg13[%c16_57, %c256_58], %79 {strides = array<i32>} : memref<36x512xf32, #tpu.memory_space<vmem>>, vector<4x256xf32>,
    %c0_59 = arith.constant 0 : index
    %c129_60 = arith.constant 129 : index
    %81 = vector.load %arg11[%c0_59, %c129_60] : memref<4x512xf32, #tpu.memory_space<vmem>>, vector<4x256xf32>
    %cst_61 = arith.constant 0.000000e+00 : f32
    %82 = vector.shape_cast %6 : vector<1x256xi1> to vector<1x256xi1>
    %83 = vector.broadcast %82 : vector<1x256xi1> to vector<4x256xi1>
    %84 = vector.broadcast %cst_61 : f32 to vector<4x256xf32>
    %85 = arith.select %83, %81, %84 : vector<4x256xi1>, vector<4x256xf32>
    %c20_62 = arith.constant 20 : index
    %c256_63 = arith.constant 256 : index
    %86 = vector.load %arg13[%c20_62, %c256_63] : memref<36x512xf32, #tpu.memory_space<vmem>>, vector<4x256xf32>
    tpu.vector_store %arg13[%c20_62, %c256_63], %85 {strides = array<i32>} : memref<36x512xf32, #tpu.memory_space<vmem>>, vector<4x256xf32>,
    %c0_64 = arith.constant 0 : index
    %c143_65 = arith.constant 143 : index
    %87 = vector.load %arg11[%c0_64, %c143_65] : memref<4x512xf32, #tpu.memory_space<vmem>>, vector<4x256xf32>
    %cst_66 = arith.constant 0.000000e+00 : f32
    %88 = vector.shape_cast %4 : vector<1x256xi1> to vector<1x256xi1>
    %89 = vector.broadcast %88 : vector<1x256xi1> to vector<4x256xi1>
    %90 = vector.broadcast %cst_66 : f32 to vector<4x256xf32>
    %91 = arith.select %89, %87, %90 : vector<4x256xi1>, vector<4x256xf32>
    %c24_67 = arith.constant 24 : index
    %c256_68 = arith.constant 256 : index
    %92 = vector.load %arg13[%c24_67, %c256_68] : memref<36x512xf32, #tpu.memory_space<vmem>>, vector<4x256xf32>
    tpu.vector_store %arg13[%c24_67, %c256_68], %91 {strides = array<i32>} : memref<36x512xf32, #tpu.memory_space<vmem>>, vector<4x256xf32>,
    %c0_69 = arith.constant 0 : index
    %c144_70 = arith.constant 144 : index
    %93 = vector.load %arg11[%c0_69, %c144_70] : memref<4x512xf32, #tpu.memory_space<vmem>>, vector<4x256xf32>
    %c28_71 = arith.constant 28 : index
    %c256_72 = arith.constant 256 : index
    %94 = vector.load %arg13[%c28_71, %c256_72] : memref<36x512xf32, #tpu.memory_space<vmem>>, vector<4x256xf32>
    tpu.vector_store %arg13[%c28_71, %c256_72], %93 {strides = array<i32>} : memref<36x512xf32, #tpu.memory_space<vmem>>, vector<4x256xf32>,
    %c0_73 = arith.constant 0 : index
    %c145_74 = arith.constant 145 : index
    %95 = vector.load %arg11[%c0_73, %c145_74] : memref<4x512xf32, #tpu.memory_space<vmem>>, vector<4x256xf32>
    %cst_75 = arith.constant 0.000000e+00 : f32
    %96 = vector.shape_cast %6 : vector<1x256xi1> to vector<1x256xi1>
    %97 = vector.broadcast %96 : vector<1x256xi1> to vector<4x256xi1>
    %98 = vector.broadcast %cst_75 : f32 to vector<4x256xf32>
    %99 = arith.select %97, %95, %98 : vector<4x256xi1>, vector<4x256xf32>
    %c32_76 = arith.constant 32 : index
    %c256_77 = arith.constant 256 : index
    %100 = vector.load %arg13[%c32_76, %c256_77] : memref<36x512xf32, #tpu.memory_space<vmem>>, vector<4x256xf32>
    tpu.vector_store %arg13[%c32_76, %c256_77], %99 {strides = array<i32>} : memref<36x512xf32, #tpu.memory_space<vmem>>, vector<4x256xf32>,
    %c0_78 = arith.constant 0 : index
    %c0_79 = arith.constant 0 : index
    %101 = vector.load %arg2[%c0_78, %c0_79] : memref<8x36xf32, #tpu.memory_space<vmem>>, vector<8x36xf32>
    %c0_80 = arith.constant 0 : index
    %c0_81 = arith.constant 0 : index
    %102 = vector.load %arg13[%c0_80, %c0_81] : memref<36x512xf32, #tpu.memory_space<vmem>>, vector<36x512xf32>
    %cst_82 = arith.constant dense<0.000000e+00> : vector<8x512xf32>
    %103 = tpu.matmul %101, %102, %cst_82 {dimension_numbers = #tpu.dot_dimension_numbers<[1], [0], [0], [1], [0, 0, 1, 1], [], []>} : vector<8x36xf32>, vector<36x512xf32>, vector<8x512xf32> -> vector<8x512xf32>
    %c0_83 = arith.constant 0 : index
    %c0_84 = arith.constant 0 : index
    %104 = vector.load %arg3[%c0_83, %c0_84] : memref<8x1xf32, #tpu.memory_space<vmem>>, vector<8x1xf32>
    %105 = vector.broadcast %104 : vector<8x1xf32> to vector<8x512xf32>
    %106 = arith.addf %103, %105 : vector<8x512xf32>
    %cst_85 = arith.constant dense<0.000000e+00> : vector<8xf32>
    %107 = vector.multi_reduction <add>, %106, %cst_85 [1] : vector<8x512xf32> to vector<8xf32>
    %108 = vector.shape_cast %107 : vector<8xf32> to vector<8x1xf32>
    %109 = arith.mulf %106, %106 : vector<8x512xf32>
    %cst_86 = arith.constant dense<0.000000e+00> : vector<8xf32>
    %110 = vector.multi_reduction <add>, %109, %cst_86 [1] : vector<8x512xf32> to vector<8xf32>
    %111 = vector.shape_cast %110 : vector<8xf32> to vector<8x1xf32>
    %cst_87 = arith.constant 5.120000e+02 : f32
    %112 = vector.broadcast %cst_87 : f32 to vector<8x1xf32>
    %113 = arith.divf %108, %112 : vector<8x1xf32>
    %cst_88 = arith.constant 5.120000e+02 : f32
    %114 = vector.broadcast %cst_88 : f32 to vector<8x1xf32>
    %115 = arith.divf %111, %114 : vector<8x1xf32>
    %116 = arith.mulf %113, %113 : vector<8x1xf32>
    %117 = arith.subf %115, %116 : vector<8x1xf32>
    %c0_89 = arith.constant 0 : index
    %c0_90 = arith.constant 0 : index
    %118 = vector.load %arg4[%c0_89, %c0_90] : memref<8x1xf32, #tpu.memory_space<vmem>>, vector<8x1xf32>
    %cst_91 = arith.constant 9.99999974E-6 : f32
    %119 = vector.broadcast %cst_91 : f32 to vector<8x1xf32>
    %120 = arith.addf %117, %119 : vector<8x1xf32>
    %121 = math.rsqrt %120 : vector<8x1xf32>
    %122 = arith.mulf %118, %121 : vector<8x1xf32>
    %c0_92 = arith.constant 0 : index
    %c0_93 = arith.constant 0 : index
    %123 = vector.load %arg5[%c0_92, %c0_93] : memref<8x1xf32, #tpu.memory_space<vmem>>, vector<8x1xf32>
    %124 = arith.mulf %113, %122 : vector<8x1xf32>
    %125 = arith.subf %123, %124 : vector<8x1xf32>
    %126 = vector.broadcast %122 : vector<8x1xf32> to vector<8x512xf32>
    %127 = arith.mulf %106, %126 : vector<8x512xf32>
    %128 = vector.broadcast %125 : vector<8x1xf32> to vector<8x512xf32>
    %129 = arith.addf %127, %128 : vector<8x512xf32>
    %cst_94 = arith.constant 0.000000e+00 : f32
    %130 = vector.broadcast %cst_94 : f32 to vector<8x512xf32>
    %131 = arith.maximumf %129, %130 : vector<8x512xf32>
    %132 = vector.extract_strided_slice %131 {offsets = [0, 0], sizes = [8, 256], strides = [1, 1]} : vector<8x512xf32> to vector<8x256xf32>
    %133 = vector.extract_strided_slice %131 {offsets = [0, 256], sizes = [8, 256], strides = [1, 1]} : vector<8x512xf32> to vector<8x256xf32>
    %cst_95 = arith.constant 0.000000e+00 : f32
    %134 = vector.broadcast %cst_95 : f32 to vector<8x128xf32>
    %c0_96 = arith.constant 0 : index
    %c0_97 = arith.constant 0 : index
    %135 = vector.load %arg12[%c0_96, %c0_97] : memref<8x512xf32, #tpu.memory_space<vmem>>, vector<8x128xf32>
    tpu.vector_store %arg12[%c0_96, %c0_97], %134 {strides = array<i32>} : memref<8x512xf32, #tpu.memory_space<vmem>>, vector<8x128xf32>,
    %cst_98 = arith.constant 0.000000e+00 : f32
    %136 = vector.broadcast %cst_98 : f32 to vector<8x128xf32>
    %c0_99 = arith.constant 0 : index
    %c384_100 = arith.constant 384 : index
    %137 = vector.load %arg12[%c0_99, %c384_100] : memref<8x512xf32, #tpu.memory_space<vmem>>, vector<8x128xf32>
    tpu.vector_store %arg12[%c0_99, %c384_100], %136 {strides = array<i32>} : memref<8x512xf32, #tpu.memory_space<vmem>>, vector<8x128xf32>,
    %c0_101 = arith.constant 0 : index
    %c128_102 = arith.constant 128 : index
    %138 = vector.load %arg12[%c0_101, %c128_102] : memref<8x512xf32, #tpu.memory_space<vmem>>, vector<8x256xf32>
    tpu.vector_store %arg12[%c0_101, %c128_102], %132 {strides = array<i32>} : memref<8x512xf32, #tpu.memory_space<vmem>>, vector<8x256xf32>,
    %c0_103 = arith.constant 0 : index
    %c111_104 = arith.constant 111 : index
    %139 = vector.load %arg12[%c0_103, %c111_104] : memref<8x512xf32, #tpu.memory_space<vmem>>, vector<8x256xf32>
    %cst_105 = arith.constant 0.000000e+00 : f32
    %140 = vector.shape_cast %4 : vector<1x256xi1> to vector<1x256xi1>
    %141 = vector.broadcast %140 : vector<1x256xi1> to vector<8x256xi1>
    %142 = vector.broadcast %cst_105 : f32 to vector<8x256xf32>
    %143 = arith.select %141, %139, %142 : vector<8x256xi1>, vector<8x256xf32>
    %c0_106 = arith.constant 0 : index
    %c0_107 = arith.constant 0 : index
    %144 = vector.load %arg14[%c0_106, %c0_107] : memref<72x512xf32, #tpu.memory_space<vmem>>, vector<8x256xf32>
    tpu.vector_store %arg14[%c0_106, %c0_107], %143 {strides = array<i32>} : memref<72x512xf32, #tpu.memory_space<vmem>>, vector<8x256xf32>,
    %c0_108 = arith.constant 0 : index
    %c112_109 = arith.constant 112 : index
    %145 = vector.load %arg12[%c0_108, %c112_109] : memref<8x512xf32, #tpu.memory_space<vmem>>, vector<8x256xf32>
    %c8_110 = arith.constant 8 : index
    %c0_111 = arith.constant 0 : index
    %146 = vector.load %arg14[%c8_110, %c0_111] : memref<72x512xf32, #tpu.memory_space<vmem>>, vector<8x256xf32>
    tpu.vector_store %arg14[%c8_110, %c0_111], %145 {strides = array<i32>} : memref<72x512xf32, #tpu.memory_space<vmem>>, vector<8x256xf32>,
    %c0_112 = arith.constant 0 : index
    %c113_113 = arith.constant 113 : index
    %147 = vector.load %arg12[%c0_112, %c113_113] : memref<8x512xf32, #tpu.memory_space<vmem>>, vector<8x256xf32>
    %cst_114 = arith.constant 0.000000e+00 : f32
    %148 = vector.shape_cast %6 : vector<1x256xi1> to vector<1x256xi1>
    %149 = vector.broadcast %148 : vector<1x256xi1> to vector<8x256xi1>
    %150 = vector.broadcast %cst_114 : f32 to vector<8x256xf32>
    %151 = arith.select %149, %147, %150 : vector<8x256xi1>, vector<8x256xf32>
    %c16_115 = arith.constant 16 : index
    %c0_116 = arith.constant 0 : index
    %152 = vector.load %arg14[%c16_115, %c0_116] : memref<72x512xf32, #tpu.memory_space<vmem>>, vector<8x256xf32>
    tpu.vector_store %arg14[%c16_115, %c0_116], %151 {strides = array<i32>} : memref<72x512xf32, #tpu.memory_space<vmem>>, vector<8x256xf32>,
    %c0_117 = arith.constant 0 : index
    %c127_118 = arith.constant 127 : index
    %153 = vector.load %arg12[%c0_117, %c127_118] : memref<8x512xf32, #tpu.memory_space<vmem>>, vector<8x256xf32>
    %cst_119 = arith.constant 0.000000e+00 : f32
    %154 = vector.shape_cast %4 : vector<1x256xi1> to vector<1x256xi1>
    %155 = vector.broadcast %154 : vector<1x256xi1> to vector<8x256xi1>
    %156 = vector.broadcast %cst_119 : f32 to vector<8x256xf32>
    %157 = arith.select %155, %153, %156 : vector<8x256xi1>, vector<8x256xf32>
    %c24_120 = arith.constant 24 : index
    %c0_121 = arith.constant 0 : index
    %158 = vector.load %arg14[%c24_120, %c0_121] : memref<72x512xf32, #tpu.memory_space<vmem>>, vector<8x256xf32>
    tpu.vector_store %arg14[%c24_120, %c0_121], %157 {strides = array<i32>} : memref<72x512xf32, #tpu.memory_space<vmem>>, vector<8x256xf32>,
    %c0_122 = arith.constant 0 : index
    %c128_123 = arith.constant 128 : index
    %159 = vector.load %arg12[%c0_122, %c128_123] : memref<8x512xf32, #tpu.memory_space<vmem>>, vector<8x256xf32>
    %c32_124 = arith.constant 32 : index
    %c0_125 = arith.constant 0 : index
    %160 = vector.load %arg14[%c32_124, %c0_125] : memref<72x512xf32, #tpu.memory_space<vmem>>, vector<8x256xf32>
    tpu.vector_store %arg14[%c32_124, %c0_125], %159 {strides = array<i32>} : memref<72x512xf32, #tpu.memory_space<vmem>>, vector<8x256xf32>,
    %c0_126 = arith.constant 0 : index
    %c129_127 = arith.constant 129 : index
    %161 = vector.load %arg12[%c0_126, %c129_127] : memref<8x512xf32, #tpu.memory_space<vmem>>, vector<8x256xf32>
    %cst_128 = arith.constant 0.000000e+00 : f32
    %162 = vector.shape_cast %6 : vector<1x256xi1> to vector<1x256xi1>
    %163 = vector.broadcast %162 : vector<1x256xi1> to vector<8x256xi1>
    %164 = vector.broadcast %cst_128 : f32 to vector<8x256xf32>
    %165 = arith.select %163, %161, %164 : vector<8x256xi1>, vector<8x256xf32>
    %c40 = arith.constant 40 : index
    %c0_129 = arith.constant 0 : index
    %166 = vector.load %arg14[%c40, %c0_129] : memref<72x512xf32, #tpu.memory_space<vmem>>, vector<8x256xf32>
    tpu.vector_store %arg14[%c40, %c0_129], %165 {strides = array<i32>} : memref<72x512xf32, #tpu.memory_space<vmem>>, vector<8x256xf32>,
    %c0_130 = arith.constant 0 : index
    %c143_131 = arith.constant 143 : index
    %167 = vector.load %arg12[%c0_130, %c143_131] : memref<8x512xf32, #tpu.memory_space<vmem>>, vector<8x256xf32>
    %cst_132 = arith.constant 0.000000e+00 : f32
    %168 = vector.shape_cast %4 : vector<1x256xi1> to vector<1x256xi1>
    %169 = vector.broadcast %168 : vector<1x256xi1> to vector<8x256xi1>
    %170 = vector.broadcast %cst_132 : f32 to vector<8x256xf32>
    %171 = arith.select %169, %167, %170 : vector<8x256xi1>, vector<8x256xf32>
    %c48 = arith.constant 48 : index
    %c0_133 = arith.constant 0 : index
    %172 = vector.load %arg14[%c48, %c0_133] : memref<72x512xf32, #tpu.memory_space<vmem>>, vector<8x256xf32>
    tpu.vector_store %arg14[%c48, %c0_133], %171 {strides = array<i32>} : memref<72x512xf32, #tpu.memory_space<vmem>>, vector<8x256xf32>,
    %c0_134 = arith.constant 0 : index
    %c144_135 = arith.constant 144 : index
    %173 = vector.load %arg12[%c0_134, %c144_135] : memref<8x512xf32, #tpu.memory_space<vmem>>, vector<8x256xf32>
    %c56 = arith.constant 56 : index
    %c0_136 = arith.constant 0 : index
    %174 = vector.load %arg14[%c56, %c0_136] : memref<72x512xf32, #tpu.memory_space<vmem>>, vector<8x256xf32>
    tpu.vector_store %arg14[%c56, %c0_136], %173 {strides = array<i32>} : memref<72x512xf32, #tpu.memory_space<vmem>>, vector<8x256xf32>,
    %c0_137 = arith.constant 0 : index
    %c145_138 = arith.constant 145 : index
    %175 = vector.load %arg12[%c0_137, %c145_138] : memref<8x512xf32, #tpu.memory_space<vmem>>, vector<8x256xf32>
    %cst_139 = arith.constant 0.000000e+00 : f32
    %176 = vector.shape_cast %6 : vector<1x256xi1> to vector<1x256xi1>
    %177 = vector.broadcast %176 : vector<1x256xi1> to vector<8x256xi1>
    %178 = vector.broadcast %cst_139 : f32 to vector<8x256xf32>
    %179 = arith.select %177, %175, %178 : vector<8x256xi1>, vector<8x256xf32>
    %c64 = arith.constant 64 : index
    %c0_140 = arith.constant 0 : index
    %180 = vector.load %arg14[%c64, %c0_140] : memref<72x512xf32, #tpu.memory_space<vmem>>, vector<8x256xf32>
    tpu.vector_store %arg14[%c64, %c0_140], %179 {strides = array<i32>} : memref<72x512xf32, #tpu.memory_space<vmem>>, vector<8x256xf32>,
    %c0_141 = arith.constant 0 : index
    %c128_142 = arith.constant 128 : index
    %181 = vector.load %arg12[%c0_141, %c128_142] : memref<8x512xf32, #tpu.memory_space<vmem>>, vector<8x256xf32>
    tpu.vector_store %arg12[%c0_141, %c128_142], %133 {strides = array<i32>} : memref<8x512xf32, #tpu.memory_space<vmem>>, vector<8x256xf32>,
    %c0_143 = arith.constant 0 : index
    %c111_144 = arith.constant 111 : index
    %182 = vector.load %arg12[%c0_143, %c111_144] : memref<8x512xf32, #tpu.memory_space<vmem>>, vector<8x256xf32>
    %cst_145 = arith.constant 0.000000e+00 : f32
    %183 = vector.shape_cast %4 : vector<1x256xi1> to vector<1x256xi1>
    %184 = vector.broadcast %183 : vector<1x256xi1> to vector<8x256xi1>
    %185 = vector.broadcast %cst_145 : f32 to vector<8x256xf32>
    %186 = arith.select %184, %182, %185 : vector<8x256xi1>, vector<8x256xf32>
    %c0_146 = arith.constant 0 : index
    %c256_147 = arith.constant 256 : index
    %187 = vector.load %arg14[%c0_146, %c256_147] : memref<72x512xf32, #tpu.memory_space<vmem>>, vector<8x256xf32>
    tpu.vector_store %arg14[%c0_146, %c256_147], %186 {strides = array<i32>} : memref<72x512xf32, #tpu.memory_space<vmem>>, vector<8x256xf32>,
    %c0_148 = arith.constant 0 : index
    %c112_149 = arith.constant 112 : index
    %188 = vector.load %arg12[%c0_148, %c112_149] : memref<8x512xf32, #tpu.memory_space<vmem>>, vector<8x256xf32>
    %c8_150 = arith.constant 8 : index
    %c256_151 = arith.constant 256 : index
    %189 = vector.load %arg14[%c8_150, %c256_151] : memref<72x512xf32, #tpu.memory_space<vmem>>, vector<8x256xf32>
    tpu.vector_store %arg14[%c8_150, %c256_151], %188 {strides = array<i32>} : memref<72x512xf32, #tpu.memory_space<vmem>>, vector<8x256xf32>,
    %c0_152 = arith.constant 0 : index
    %c113_153 = arith.constant 113 : index
    %190 = vector.load %arg12[%c0_152, %c113_153] : memref<8x512xf32, #tpu.memory_space<vmem>>, vector<8x256xf32>
    %cst_154 = arith.constant 0.000000e+00 : f32
    %191 = vector.shape_cast %6 : vector<1x256xi1> to vector<1x256xi1>
    %192 = vector.broadcast %191 : vector<1x256xi1> to vector<8x256xi1>
    %193 = vector.broadcast %cst_154 : f32 to vector<8x256xf32>
    %194 = arith.select %192, %190, %193 : vector<8x256xi1>, vector<8x256xf32>
    %c16_155 = arith.constant 16 : index
    %c256_156 = arith.constant 256 : index
    %195 = vector.load %arg14[%c16_155, %c256_156] : memref<72x512xf32, #tpu.memory_space<vmem>>, vector<8x256xf32>
    tpu.vector_store %arg14[%c16_155, %c256_156], %194 {strides = array<i32>} : memref<72x512xf32, #tpu.memory_space<vmem>>, vector<8x256xf32>,
    %c0_157 = arith.constant 0 : index
    %c127_158 = arith.constant 127 : index
    %196 = vector.load %arg12[%c0_157, %c127_158] : memref<8x512xf32, #tpu.memory_space<vmem>>, vector<8x256xf32>
    %cst_159 = arith.constant 0.000000e+00 : f32
    %197 = vector.shape_cast %4 : vector<1x256xi1> to vector<1x256xi1>
    %198 = vector.broadcast %197 : vector<1x256xi1> to vector<8x256xi1>
    %199 = vector.broadcast %cst_159 : f32 to vector<8x256xf32>
    %200 = arith.select %198, %196, %199 : vector<8x256xi1>, vector<8x256xf32>
    %c24_160 = arith.constant 24 : index
    %c256_161 = arith.constant 256 : index
    %201 = vector.load %arg14[%c24_160, %c256_161] : memref<72x512xf32, #tpu.memory_space<vmem>>, vector<8x256xf32>
    tpu.vector_store %arg14[%c24_160, %c256_161], %200 {strides = array<i32>} : memref<72x512xf32, #tpu.memory_space<vmem>>, vector<8x256xf32>,
    %c0_162 = arith.constant 0 : index
    %c128_163 = arith.constant 128 : index
    %202 = vector.load %arg12[%c0_162, %c128_163] : memref<8x512xf32, #tpu.memory_space<vmem>>, vector<8x256xf32>
    %c32_164 = arith.constant 32 : index
    %c256_165 = arith.constant 256 : index
    %203 = vector.load %arg14[%c32_164, %c256_165] : memref<72x512xf32, #tpu.memory_space<vmem>>, vector<8x256xf32>
    tpu.vector_store %arg14[%c32_164, %c256_165], %202 {strides = array<i32>} : memref<72x512xf32, #tpu.memory_space<vmem>>, vector<8x256xf32>,
    %c0_166 = arith.constant 0 : index
    %c129_167 = arith.constant 129 : index
    %204 = vector.load %arg12[%c0_166, %c129_167] : memref<8x512xf32, #tpu.memory_space<vmem>>, vector<8x256xf32>
    %cst_168 = arith.constant 0.000000e+00 : f32
    %205 = vector.shape_cast %6 : vector<1x256xi1> to vector<1x256xi1>
    %206 = vector.broadcast %205 : vector<1x256xi1> to vector<8x256xi1>
    %207 = vector.broadcast %cst_168 : f32 to vector<8x256xf32>
    %208 = arith.select %206, %204, %207 : vector<8x256xi1>, vector<8x256xf32>
    %c40_169 = arith.constant 40 : index
    %c256_170 = arith.constant 256 : index
    %209 = vector.load %arg14[%c40_169, %c256_170] : memref<72x512xf32, #tpu.memory_space<vmem>>, vector<8x256xf32>
    tpu.vector_store %arg14[%c40_169, %c256_170], %208 {strides = array<i32>} : memref<72x512xf32, #tpu.memory_space<vmem>>, vector<8x256xf32>,
    %c0_171 = arith.constant 0 : index
    %c143_172 = arith.constant 143 : index
    %210 = vector.load %arg12[%c0_171, %c143_172] : memref<8x512xf32, #tpu.memory_space<vmem>>, vector<8x256xf32>
    %cst_173 = arith.constant 0.000000e+00 : f32
    %211 = vector.shape_cast %4 : vector<1x256xi1> to vector<1x256xi1>
    %212 = vector.broadcast %211 : vector<1x256xi1> to vector<8x256xi1>
    %213 = vector.broadcast %cst_173 : f32 to vector<8x256xf32>
    %214 = arith.select %212, %210, %213 : vector<8x256xi1>, vector<8x256xf32>
    %c48_174 = arith.constant 48 : index
    %c256_175 = arith.constant 256 : index
    %215 = vector.load %arg14[%c48_174, %c256_175] : memref<72x512xf32, #tpu.memory_space<vmem>>, vector<8x256xf32>
    tpu.vector_store %arg14[%c48_174, %c256_175], %214 {strides = array<i32>} : memref<72x512xf32, #tpu.memory_space<vmem>>, vector<8x256xf32>,
    %c0_176 = arith.constant 0 : index
    %c144_177 = arith.constant 144 : index
    %216 = vector.load %arg12[%c0_176, %c144_177] : memref<8x512xf32, #tpu.memory_space<vmem>>, vector<8x256xf32>
    %c56_178 = arith.constant 56 : index
    %c256_179 = arith.constant 256 : index
    %217 = vector.load %arg14[%c56_178, %c256_179] : memref<72x512xf32, #tpu.memory_space<vmem>>, vector<8x256xf32>
    tpu.vector_store %arg14[%c56_178, %c256_179], %216 {strides = array<i32>} : memref<72x512xf32, #tpu.memory_space<vmem>>, vector<8x256xf32>,
    %c0_180 = arith.constant 0 : index
    %c145_181 = arith.constant 145 : index
    %218 = vector.load %arg12[%c0_180, %c145_181] : memref<8x512xf32, #tpu.memory_space<vmem>>, vector<8x256xf32>
    %cst_182 = arith.constant 0.000000e+00 : f32
    %219 = vector.shape_cast %6 : vector<1x256xi1> to vector<1x256xi1>
    %220 = vector.broadcast %219 : vector<1x256xi1> to vector<8x256xi1>
    %221 = vector.broadcast %cst_182 : f32 to vector<8x256xf32>
    %222 = arith.select %220, %218, %221 : vector<8x256xi1>, vector<8x256xf32>
    %c64_183 = arith.constant 64 : index
    %c256_184 = arith.constant 256 : index
    %223 = vector.load %arg14[%c64_183, %c256_184] : memref<72x512xf32, #tpu.memory_space<vmem>>, vector<8x256xf32>
    tpu.vector_store %arg14[%c64_183, %c256_184], %222 {strides = array<i32>} : memref<72x512xf32, #tpu.memory_space<vmem>>, vector<8x256xf32>,
    %c0_185 = arith.constant 0 : index
    %c0_186 = arith.constant 0 : index
    %224 = vector.load %arg6[%c0_185, %c0_186] : memref<8x72xf32, #tpu.memory_space<vmem>>, vector<8x72xf32>
    %c0_187 = arith.constant 0 : index
    %c0_188 = arith.constant 0 : index
    %225 = vector.load %arg14[%c0_187, %c0_188] : memref<72x512xf32, #tpu.memory_space<vmem>>, vector<72x512xf32>
    %cst_189 = arith.constant dense<0.000000e+00> : vector<8x512xf32>
    %226 = tpu.matmul %224, %225, %cst_189 {dimension_numbers = #tpu.dot_dimension_numbers<[1], [0], [0], [1], [0, 0, 1, 1], [], []>} : vector<8x72xf32>, vector<72x512xf32>, vector<8x512xf32> -> vector<8x512xf32>
    %c0_190 = arith.constant 0 : index
    %c0_191 = arith.constant 0 : index
    %227 = vector.load %arg7[%c0_190, %c0_191] : memref<8x1xf32, #tpu.memory_space<vmem>>, vector<8x1xf32>
    %228 = vector.broadcast %227 : vector<8x1xf32> to vector<8x512xf32>
    %229 = arith.addf %226, %228 : vector<8x512xf32>
    %cst_192 = arith.constant dense<0.000000e+00> : vector<8xf32>
    %230 = vector.multi_reduction <add>, %229, %cst_192 [1] : vector<8x512xf32> to vector<8xf32>
    %231 = vector.shape_cast %230 : vector<8xf32> to vector<8x1xf32>
    %232 = arith.mulf %229, %229 : vector<8x512xf32>
    %cst_193 = arith.constant dense<0.000000e+00> : vector<8xf32>
    %233 = vector.multi_reduction <add>, %232, %cst_193 [1] : vector<8x512xf32> to vector<8xf32>
    %234 = vector.shape_cast %233 : vector<8xf32> to vector<8x1xf32>
    %cst_194 = arith.constant 5.120000e+02 : f32
    %235 = vector.broadcast %cst_194 : f32 to vector<8x1xf32>
    %236 = arith.divf %231, %235 : vector<8x1xf32>
    %cst_195 = arith.constant 5.120000e+02 : f32
    %237 = vector.broadcast %cst_195 : f32 to vector<8x1xf32>
    %238 = arith.divf %234, %237 : vector<8x1xf32>
    %239 = arith.mulf %236, %236 : vector<8x1xf32>
    %240 = arith.subf %238, %239 : vector<8x1xf32>
    %c0_196 = arith.constant 0 : index
    %c0_197 = arith.constant 0 : index
    %241 = vector.load %arg8[%c0_196, %c0_197] : memref<8x1xf32, #tpu.memory_space<vmem>>, vector<8x1xf32>
    %cst_198 = arith.constant 9.99999974E-6 : f32
    %242 = vector.broadcast %cst_198 : f32 to vector<8x1xf32>
    %243 = arith.addf %240, %242 : vector<8x1xf32>
    %244 = math.rsqrt %243 : vector<8x1xf32>
    %245 = arith.mulf %241, %244 : vector<8x1xf32>
    %c0_199 = arith.constant 0 : index
    %c0_200 = arith.constant 0 : index
    %246 = vector.load %arg9[%c0_199, %c0_200] : memref<8x1xf32, #tpu.memory_space<vmem>>, vector<8x1xf32>
    %247 = arith.mulf %236, %245 : vector<8x1xf32>
    %248 = arith.subf %246, %247 : vector<8x1xf32>
    %249 = vector.broadcast %245 : vector<8x1xf32> to vector<8x512xf32>
    %250 = arith.mulf %229, %249 : vector<8x512xf32>
    %251 = vector.broadcast %248 : vector<8x1xf32> to vector<8x512xf32>
    %252 = arith.addf %250, %251 : vector<8x512xf32>
    %cst_201 = arith.constant 0.000000e+00 : f32
    %253 = vector.broadcast %cst_201 : f32 to vector<8x512xf32>
    %254 = arith.maximumf %252, %253 : vector<8x512xf32>
    %255 = vector.extract_strided_slice %254 {offsets = [0, 0], sizes = [8, 256], strides = [1, 1]} : vector<8x512xf32> to vector<8x256xf32>
    %c0_202 = arith.constant 0 : index
    %c0_203 = arith.constant 0 : index
    %c0_204 = arith.constant 0 : index
    %256 = vector.load %arg10[%c0_202, %c0_203, %c0_204] : memref<2x8x256xf32, #tpu.memory_space<vmem>>, vector<1x8x256xf32>
    %257 = vector.shape_cast %256 : vector<1x8x256xf32> to vector<8x256xf32>
    %258 = vector.shape_cast %255 : vector<8x256xf32> to vector<1x8x256xf32>
    tpu.vector_store %arg10[%c0_202, %c0_203, %c0_204], %258 {strides = array<i32>} : memref<2x8x256xf32, #tpu.memory_space<vmem>>, vector<1x8x256xf32>,
    %259 = vector.extract_strided_slice %254 {offsets = [0, 256], sizes = [8, 256], strides = [1, 1]} : vector<8x512xf32> to vector<8x256xf32>
    %c1_205 = arith.constant 1 : index
    %c0_206 = arith.constant 0 : index
    %c0_207 = arith.constant 0 : index
    %260 = vector.load %arg10[%c1_205, %c0_206, %c0_207] : memref<2x8x256xf32, #tpu.memory_space<vmem>>, vector<1x8x256xf32>
    %261 = vector.shape_cast %260 : vector<1x8x256xf32> to vector<8x256xf32>
    %262 = vector.shape_cast %259 : vector<8x256xf32> to vector<1x8x256xf32>
    tpu.vector_store %arg10[%c1_205, %c0_206, %c0_207], %262 {strides = array<i32>} : memref<2x8x256xf32, #tpu.memory_space<vmem>>, vector<1x8x256xf32>,
    return
  }
  func.func @transform_0(%arg0: i32) -> (i32, i32, i32) {
    %c0_i32 = arith.constant 0 : i32
    %c0_i32_0 = arith.constant 0 : i32
    %c0_i32_1 = arith.constant 0 : i32
    %c0_i32_2 = arith.constant 0 : i32
    return %c0_i32, %c0_i32_0, %c0_i32_1 : i32, i32, i32
  }
  func.func @transform_1(%arg0: i32) -> (i32, i32) {
    %c0_i32 = arith.constant 0 : i32
    %c0_i32_0 = arith.constant 0 : i32
    %c0_i32_1 = arith.constant 0 : i32
    return %c0_i32, %c0_i32_0 : i32, i32
  }
  func.func @transform_2(%arg0: i32) -> (i32, i32) {
    %c0_i32 = arith.constant 0 : i32
    %c0_i32_0 = arith.constant 0 : i32
    %c0_i32_1 = arith.constant 0 : i32
    return %c0_i32, %c0_i32_0 : i32, i32
  }
  func.func @transform_3(%arg0: i32) -> (i32, i32) {
    %c0_i32 = arith.constant 0 : i32
    %c0_i32_0 = arith.constant 0 : i32
    %c0_i32_1 = arith.constant 0 : i32
    return %c0_i32, %c0_i32_0 : i32, i32
  }
  func.func @transform_4(%arg0: i32) -> (i32, i32) {
    %c0_i32 = arith.constant 0 : i32
    %c0_i32_0 = arith.constant 0 : i32
    %c0_i32_1 = arith.constant 0 : i32
    return %c0_i32, %c0_i32_0 : i32, i32
  }
  func.func @transform_5(%arg0: i32) -> (i32, i32) {
    %c0_i32 = arith.constant 0 : i32
    %c0_i32_0 = arith.constant 0 : i32
    %c0_i32_1 = arith.constant 0 : i32
    return %c0_i32, %c0_i32_0 : i32, i32
  }
  func.func @transform_6(%arg0: i32) -> (i32, i32) {
    %c0_i32 = arith.constant 0 : i32
    %c0_i32_0 = arith.constant 0 : i32
    %c0_i32_1 = arith.constant 0 : i32
    return %c0_i32, %c0_i32_0 : i32, i32
  }
  func.func @transform_7(%arg0: i32) -> (i32, i32) {
    %c0_i32 = arith.constant 0 : i32
    %c0_i32_0 = arith.constant 0 : i32
    %c0_i32_1 = arith.constant 0 : i32
    return %c0_i32, %c0_i32_0 : i32, i32
  }
  func.func @transform_8(%arg0: i32) -> (i32, i32) {
    %c0_i32 = arith.constant 0 : i32
    %c0_i32_0 = arith.constant 0 : i32
    %c0_i32_1 = arith.constant 0 : i32
    return %c0_i32, %c0_i32_0 : i32, i32
  }
  func.func @transform_9(%arg0: i32) -> (i32, i32, i32) {
    %c0_i32 = arith.constant 0 : i32
    %c0_i32_0 = arith.constant 0 : i32
    %c0_i32_1 = arith.constant 0 : i32
    %c0_i32_2 = arith.constant 0 : i32
    return %c0_i32, %c0_i32_0, %c0_i32_1 : i32, i32, i32
  }
}

</mosaic_0001>

<bundles_post_ra>
// kernel: conv_block_forward.1
= control target key start
LH: loop header
LB: loop body
LE: loop exit
PB: predicated region body
PF: predicated region fallthrough
CT: control target
= control target key end

     0   :  { %v1447_v2 = vmov 0.0   ;;  %s1449_s13 = smov 17   ;;  %s1450_s14 = smov 15   ;;  %v1456_v31 = vmov 0   ;;  %v32_v33 = vlaneseq  ;;  %vm62_vm0 = vcmask 138240   ;;  %s1912_s0 = inlined_call_operand.vmem [shape: f32[2,4,256], index: 0, kind: input, shape index: {}]   ;;  %s1913_s2 = inlined_call_operand.vmem [shape: f32[8,1], index: 2, kind: input, shape index: {}]   ;;  %s1914_s1 = inlined_call_operand.vmem [shape: f32[8,36], index: 1, kind: input, shape index: {}]   ;;  %s1915_s3 = inlined_call_operand.vmem [shape: f32[8,1], index: 3, kind: input, shape index: {}]   ;;  %s1916_s4 = inlined_call_operand.vmem [shape: f32[8,1], index: 4, kind: input, shape index: {}]   ;;  %s1917_s6 = inlined_call_operand.vmem [shape: f32[8,1], index: 6, kind: input, shape index: {}]   ;;  %s1918_s5 = inlined_call_operand.vmem [shape: f32[8,72], index: 5, kind: input, shape index: {}]   ;;  %s1919_s7 = inlined_call_operand.vmem [shape: f32[8,1], index: 7, kind: input, shape index: {}]   ;;  %s1920_s8 = inlined_call_operand.vmem [shape: f32[8,1], index: 8, kind: input, shape index: {}]   ;;  %s1921_s9 = inlined_call_operand.vmem [shape: f32[2,8,256], index: 9, kind: output, shape index: {}]  }
   0x1   :  { %v1511_v0 = vld [vmem:[%s1912_s0] sm:$0xff]  ;;  %v1516_v1 = vld [vmem:[%s1912_s0 + $0x8] sm:$0xff]  ;;  %44 = vst [vmem:[#allocation2] sm:$0xf] %v1447_v2  ;;  %45 = vst [vmem:[#allocation2 + $0xc] sm:$0xf] %v1447_v2  ;;  %508 = vmatprep.mubr.f32.mxu0 %v1447_v2  ;;  %579 = vmatprep.mubr.f32.mxu1 %v1447_v2 }
   0x2   :  { %46 = vst [vmem:[#allocation2 + $0x4] sm:$0xff] %v1511_v0  ;;  %144 = vst [vmem:[#allocation4 + $0x40] sm:$0xf] %v1511_v0  ;;  %v1526_v3 = vcombine.high %v1511_v0, %v1511_v0  ;;  %v1530_v4 = vcombine.high %v1516_v1, %v1516_v1  ;;  %s1448_s0 = smov 1   ;;  %s1451_s15 = smov 16   ;;  %v196_v26 = vcombine.low %v1511_v0, %v1511_v0  ;;  %1325 = vset.pattern.permute.xlu0 %v1456_v31  ;;  %v421_v32 = vld [vmem:[%s1913_s2] sm:$0xff] }
   0x3   :  { %317 = vst [vmem:[#allocation4 + $0x50] sm:$0xf] %v1516_v1  ;;  %s1452_s16 = smov 127   ;;  %s1453_s17 = smov 113   ;;  %v367_v27 = vcombine.low %v1516_v1, %v1516_v1  ;;  %1326 = vset.pattern.permute.xlu1 %v1456_v31  ;;  %v33_v34 = vand.u32 127, %v32_v33  ;;  %vm125_vm3 = vcmask 7168  }
   0x4   :  { %145 = vst [vmem:[#allocation4 + $0x48] sm:$0xf] %v1526_v3  ;;  %318 = vst [vmem:[#allocation4 + $0x58] sm:$0xf] %v1530_v4  ;;  %s1454_s18 = smov 112   ;;  %s1455_s19 = smov 111  }
   0x5   :  { %v34_v35 = vadd.s32 128, %v33_v34  ;;  %v35_v38 = vand.u32 15, %v33_v34  ;;  %vm105_vm4 = vcmask 121856   ;;  %vm83_vm6 = vcmask 130048  }
   0x6   :  { %vm157_vm8 = vcmask 1039360   ;;  %vm183_vm9 = vcmask 924672   ;;  %vm204_vm10 = vcmask 916480   ;;  %vm222_vm11 = vcmask 908288  }
   0x7   :  { %v36_v39 = vand.u32 15, %v34_v35  ;;  %vm1603_vm1 = vcmp.ge.s32.totalorder %v35_v38, 1  ;;  %vm1631_vm7 = vcmp.le.s32.totalorder %v35_v38, 14  ;;  %vm431_vm12 = vcmask 1043456  }
   0x8   :  { %v147_v15 = vld [vmem:[#allocation2 + $0xc] sm:$0xf]  ;;  %vm427_vm13 = vcmask 293888   ;;  %vm1457_vm14 = vmmov 1  }
   0x9   :  { %v115_v5 = vld [vmem:[#allocation2 + $0x8] sm:$0xf]  ;;  %v114_v6 = vld [vmem:[#allocation2] sm:$0xff]  ;;  %v320_v16 = vld [vmem:[#allocation2 + $0xc] sm:$0xf]  ;;  %vm1607_vm2 = vcmp.ge.s32.totalorder %v36_v39, 1 }
   0xa   :  { %v48_v7 = vld [vmem:[#allocation2 + $0x8] sm:$0xf]  ;;  %123 = vrot.lane.b32.xlu0 %v115_v5, %s1448_s0  ;;  %119 = vrot.lane.b32.xlu1 %v114_v6, %s1448_s0  ;;  %v55_v10 = vcombine.high %v114_v6, %v114_v6  ;;  %v75_v13 = vcombine.low %v114_v6, %v114_v6  ;;  %v1315_v17 = vpack.i.bf16 %v320_v16, %v147_v15  ;;  %v173_v20 = vld [vmem:[#allocation2 + $0xc] sm:$0xf]  ;;  %vm1617_vm5 = vcmp.le.s32.totalorder %v36_v39, 14  ;;  %vm1779_vm15 = vmpackc.low %vm1457_vm14, %vm1607_vm2 }
   0xb   :  { %v91_v8 = vld [vmem:[#allocation2 + $0x8] sm:$0xf]  ;;  %v345_v21 = vld [vmem:[#allocation2 + $0xc] sm:$0xf] }
   0xc   :  { %v1433_v9 = vld [vmem:[#allocation2 + $0x8] ss:$0 sps:$4 sm:$0xff]   ;;  %v1320_v22 = vpack.i.bf16 %v345_v21, %v173_v20  ;;  %v1438_v25 = vld [vmem:[#allocation2 + $0xc] ss:$0 sps:$4 sm:$0xff]  }
   0xd   :  { %231 = vst [vmem:[#allocation2 + $0x4] sm:$0xff] %v1516_v1  ;;  %v1442_v28 = vld [vmem:[#allocation2 + $0xc] ss:$0 sps:$4 sm:$0xff]  }
   0xe   :  { %60 = vrot.lane.b32.xlu0 %v48_v7, %s1449_s13  ;;  %56 = vrot.lane.b32.xlu1 %v114_v6, %s1449_s13  ;;  %v212_v29 = vld [vmem:[#allocation2 + $0xc] sm:$0xf] }
   0xf   :  { %v382_v30 = vld [vmem:[#allocation2 + $0xc] sm:$0xf] }
  0x12   :  { %103 = vrot.lane.b32.xlu0 %v91_v8, %s1450_s14  ;;  %58 = vrot.lane.b32.xlu1 %v55_v10, %s1449_s13 }
  0x14   :  { %v288_v11 = vld [vmem:[#allocation2] sm:$0xff]  ;;  %v289_v14 = vld [vmem:[#allocation2 + $0x8] sm:$0xf] }
  0x15   :  { %v292_v12 = vcombine.high %v288_v11, %v288_v11  ;;  %v233_v18 = vld [vmem:[#allocation2 + $0x8] sm:$0xf]  ;;  %v255_v24 = vcombine.low %v288_v11, %v288_v11 }
  0x16   :  { %121 = vrot.lane.b32.xlu0 %v55_v10, %s1448_s0  ;;  %101 = vrot.lane.b32.xlu1 %v55_v10, %s1450_s14  ;;  %v270_v19 = vld [vmem:[#allocation2 + $0x8] sm:$0xf] }
  0x17   :  { %v1437_v23 = vld [vmem:[#allocation2 + $0x8] ss:$0 sps:$4 sm:$0xff]  }
  0x1a   :  { %79 = vrot.lane.b32.xlu0 %v114_v6, %s1451_s15  ;;  %81 = vrot.lane.b32.xlu1 %v1433_v9, %s1451_s15 }
  0x1e   :  { %99 = vrot.lane.b32.xlu0 %v114_v6, %s1450_s14  ;;  %295 = vrot.lane.b32.xlu1 %v292_v12, %s1448_s0 }
  0x22   :  { %297 = vrot.lane.b32.xlu0 %v289_v14, %s1448_s0  ;;  %77 = vrot.lane.b32.xlu1 %v75_v13, %s1451_s15 }
  0x26   :  { %153 = vrot.lane.b32.xlu0 %v1526_v3, %s1452_s16  ;;  %1316 = vrot.lane.b32.xlu1 %v1315_v17, %s1452_s16 }
  0x2a   :  { %293 = vrot.lane.b32.xlu0 %v288_v11, %s1448_s0  ;;  %151 = vrot.lane.b32.xlu1 %v1511_v0, %s1452_s16 }
  0x2e   :  { %239 = vrot.lane.b32.xlu0 %v292_v12, %s1449_s13  ;;  %241 = vrot.lane.b32.xlu1 %v233_v18, %s1449_s13 }
  0x32   :  { %276 = vrot.lane.b32.xlu0 %v292_v12, %s1450_s14  ;;  %278 = vrot.lane.b32.xlu1 %v270_v19, %s1450_s14 }
  0x36   :  { %179 = vrot.lane.b32.xlu0 %v1526_v3, %s1453_s17  ;;  %1321 = vrot.lane.b32.xlu1 %v1320_v22, %s1453_s17 }
  0x3a   :  { %237 = vrot.lane.b32.xlu0 %v288_v11, %s1449_s13  ;;  %259 = vrot.lane.b32.xlu1 %v288_v11, %s1451_s15 }
  0x3e   :  { %261 = vrot.lane.b32.xlu0 %v1437_v23, %s1451_s15  ;;  %274 = vrot.lane.b32.xlu1 %v288_v11, %s1450_s14 }
  0x42   :  { %177 = vrot.lane.b32.xlu0 %v1511_v0, %s1453_s17  ;;  %200 = vrot.lane.b32.xlu1 %v1511_v0, %s1454_s18 }
  0x46   :  { %202 = vrot.lane.b32.xlu0 %v1438_v25, %s1454_s18  ;;  %257 = vrot.lane.b32.xlu1 %v255_v24, %s1451_s15 }
  0x4a   :  { %326 = vrot.lane.b32.xlu0 %v1530_v4, %s1452_s16  ;;  %198 = vrot.lane.b32.xlu1 %v196_v26, %s1454_s18 }
  0x4e   :  { %324 = vrot.lane.b32.xlu0 %v1516_v1, %s1452_s16  ;;  %351 = vrot.lane.b32.xlu1 %v1530_v4, %s1453_s17 }
  0x52   :  { %349 = vrot.lane.b32.xlu0 %v1516_v1, %s1453_s17  ;;  %371 = vrot.lane.b32.xlu1 %v1516_v1, %s1454_s18 }
  0x56   :  { %373 = vrot.lane.b32.xlu0 %v1442_v28, %s1454_s18  ;;  %369 = vrot.lane.b32.xlu1 %v367_v27, %s1454_s18 }
  0x5a   :  { %218 = vrot.lane.b32.xlu0 %v1526_v3, %s1455_s19  ;;  %220 = vrot.lane.b32.xlu1 %v212_v29, %s1455_s19 }
  0x5e   :  { %216 = vrot.lane.b32.xlu0 %v1511_v0, %s1455_s19  ;;  %388 = vrot.lane.b32.xlu1 %v1530_v4, %s1455_s19 }
  0x62   :  { %390 = vrot.lane.b32.xlu0 %v382_v30, %s1455_s19  ;;  %386 = vrot.lane.b32.xlu1 %v1516_v1, %s1455_s19 }
  0x66   :  { %424 = vperm.xlu0 %1325, %v421_v32  }
  0x7c   :  { %v124_v36 = vpop.permute.xlu0 %123  ;;  %v120_v37 = vpop.permute.xlu1 %119 }
  0x80   :  { %v61_v40 = vpop.permute.xlu0 %60  ;;  %v57_v41 = vpop.permute.xlu1 %56 }
  0x84   :  { %v104_v44 = vpop.permute.xlu0 %103  ;;  %v59_v45 = vpop.permute.xlu1 %58 }
  0x85   :  { %v63_v46 = vsel %vm62_vm0, %v57_v41, %v59_v45  ;;  %v64_v47 = vsel %vm62_vm0, %v59_v45, %v61_v40 }
  0x86   :  { %v67_v48 = vsel %vm1603_vm1, %v63_v46, 0.0  ;;  %v68_v49 = vsel %vm1607_vm2, %v64_v47, 0.0 }
  0x87   :  { %69 = vst [vmem:[#allocation4] sm:$0xf] %v67_v48  ;;  %70 = vst [vmem:[#allocation4 + $0x8] sm:$0xf] %v68_v49 }
  0x88   :  { %v122_v51 = vpop.permute.xlu0 %121  ;;  %v102_v52 = vpop.permute.xlu1 %101 }
  0x89   :  { %v126_v53 = vsel %vm125_vm3, %v120_v37, %v122_v51  ;;  %v127_v54 = vsel %vm125_vm3, %v122_v51, %v124_v36  ;;  %v107_v55 = vsel %vm105_vm4, %v102_v52, %v104_v44 }
  0x8a   :  { %v130_v56 = vsel %vm1603_vm1, %v126_v53, 0.0  ;;  %v131_v57 = vsel %vm1607_vm2, %v127_v54, 0.0  ;;  %v111_v58 = vsel %vm1617_vm5, %v107_v55, 0.0 }
  0x8b   :  { %v134_v59 = vrot.slane %v130_v56, 4  ;;  %v135_v60 = vrot.slane %v131_v57, 4  ;;  %113 = vst [vmem:[#allocation4 + $0x28] sm:$0xf] %v111_v58 }
  0x8c   :  { %v80_v61 = vpop.permute.xlu0 %79  ;;  %v82_v62 = vpop.permute.xlu1 %81 }
  0x8d   :  { %138 = vst [vmem:[#allocation4 + $0x20] sm:$0xf0] %v134_v59  ;;  %139 = vst [vmem:[#allocation4 + $0x28] sm:$0xf0] %v135_v60  ;;  %v85_v63 = vsel %vm83_vm6, %v80_v61, %v82_v62 }
  0x8e   :  { %89 = vst [vmem:[#allocation4 + $0x8] sm:$0xf0] %v85_v63 }
  0x90   :  { %v100_v1 = vpop.permute.xlu0 %99  ;;  %v296_v3 = vpop.permute.xlu1 %295 }
  0x91   :  { %v106_v4 = vsel %vm105_vm4, %v100_v1, %v102_v52 }
  0x92   :  { %v110_v5 = vsel %vm1631_vm7, %v106_v4, 0.0 }
  0x93   :  { %112 = vst [vmem:[#allocation4 + $0x20] sm:$0xf] %v110_v5 }
  0x94   :  { %v298_v6 = vpop.permute.xlu0 %297  ;;  %v78_v7 = vpop.permute.xlu1 %77  ;;  %v406_v8 = vld [vmem:[#allocation4 + $0x28] sm:$0xff] }
  0x95   :  { %v300_v9 = vsel %vm125_vm3, %v296_v3, %v298_v6  ;;  %v84_v10 = vsel %vm83_vm6, %v78_v7, %v80_v61  ;;  %v402_v11 = vld [vmem:[#allocation4 + $0x8] sm:$0xff] }
  0x96   :  { %v304_v12 = vsel %vm1607_vm2, %v300_v9, 0.0  ;;  %88 = vst [vmem:[#allocation4] sm:$0xf0] %v84_v10  ;;  %v1240_v13 = vpack.c.bf16 %v406_v8, %v402_v11 }
  0x97   :  { %v308_v14 = vrot.slane %v304_v12, 4 }
  0x98   :  { %v154_v15 = vpop.permute.xlu0 %153  ;;  %1241 = vmatprep.subr.bf16.mxu0 %v1240_v13  ;;  %v1642_v16 = vpop.permute.xlu1 %1316 }
  0x99   :  { %312 = vst [vmem:[#allocation4 + $0x38] sm:$0xf0] %v308_v14  ;;  %v1318_v17 = vunpack.i.l.bf16 %v1642_v16  ;;  %v1319_v6 = vunpack.i.h.bf16 %v1642_v16 }
  0x9a   :  { %v405_v26 = vld [vmem:[#allocation4 + $0x20] sm:$0xff] }
  0x9b   :  { %v159_v18 = vsel %vm157_vm8, %v154_v15, %v1318_v17 }
  0x9c   :  { %v163_v19 = vsel %vm1617_vm5, %v159_v18, 0.0  ;;  %v294_v20 = vpop.permute.xlu0 %293  ;;  %v152_v21 = vpop.permute.xlu1 %151 }
  0x9d   :  { %v167_v22 = vrot.slane %v163_v19, 4  ;;  %v299_v23 = vsel %vm125_vm3, %v294_v20, %v296_v3  ;;  %v158_v24 = vsel %vm157_vm8, %v152_v21, %v154_v15  ;;  %v401_v25 = vld [vmem:[#allocation4] sm:$0xff] }
  0x9e   :  { %v303_v27 = vsel %vm1603_vm1, %v299_v23, 0.0  ;;  %v162_v28 = vsel %vm1631_vm7, %v158_v24, 0.0  ;;  %v1242_v29 = vpack.c.bf16 %v405_v26, %v401_v25 }
  0x9f   :  { %171 = vst [vmem:[#allocation4 + $0x48] sm:$0xf0] %v167_v22  ;;  %v307_v30 = vrot.slane %v303_v27, 4  ;;  %v166_v31 = vrot.slane %v162_v28, 4 }
  0xa0   :  { %v240_v32 = vpop.permute.xlu0 %239  ;;  %1243 = vmatpush1.bf16.msra.mxu0 %v1242_v29  ;;  %v242_v33 = vpop.permute.xlu1 %241 }
  0xa1   :  { %311 = vst [vmem:[#allocation4 + $0x30] sm:$0xf0] %v307_v30  ;;  %170 = vst [vmem:[#allocation4 + $0x40] sm:$0xf0] %v166_v31  ;;  %v244_v34 = vsel %vm62_vm0, %v240_v32, %v242_v33 }
  0xa2   :  { %v248_v35 = vsel %vm1607_vm2, %v244_v34, 0.0 }
  0xa3   :  { %250 = vst [vmem:[#allocation4 + $0x18] sm:$0xf] %v248_v35 }
  0xa4   :  { %v277_v36 = vpop.permute.xlu0 %276  ;;  %v279_v37 = vpop.permute.xlu1 %278 }
  0xa5   :  { %v281_v38 = vsel %vm105_vm4, %v277_v36, %v279_v37 }
  0xa6   :  { %v285_v39 = vsel %vm1617_vm5, %v281_v38, 0.0  ;;  %v410_v17 = vld [vmem:[#allocation4 + $0x48] sm:$0xff] }
  0xa7   :  { %287 = vst [vmem:[#allocation4 + $0x38] sm:$0xf] %v285_v39 }
  0xa8   :  { %v180_v40 = vpop.permute.xlu0 %179  ;;  %v1322_v41 = vpop.permute.xlu1 %1321  ;;  %v409_v30 = vld [vmem:[#allocation4 + $0x40] sm:$0xff] }
  0xa9   :  { %v1323_v44 = vunpack.i.l.bf16 %v1322_v41  ;;  %v1324_v12 = vunpack.i.h.bf16 %v1322_v41 }
  0xab   :  { %v185_v45 = vsel %vm183_vm9, %v180_v40, %v1323_v44 }
  0xac   :  { %v189_v46 = vsel %vm1607_vm2, %v185_v45, 0.0  ;;  %v238_v47 = vpop.permute.xlu0 %237  ;;  %v260_v48 = vpop.permute.xlu1 %259 }
  0xad   :  { %191 = vst [vmem:[#allocation4 + $0x68] sm:$0xf] %v189_v46  ;;  %v243_v49 = vsel %vm62_vm0, %v238_v47, %v240_v32 }
  0xae   :  { %v247_v51 = vsel %vm1603_vm1, %v243_v49, 0.0  ;;  %v408_v4 = vld [vmem:[#allocation4 + $0x38] sm:$0xff] }
  0xaf   :  { %249 = vst [vmem:[#allocation4 + $0x10] sm:$0xf] %v247_v51 }
  0xb0   :  { %v262_v52 = vpop.permute.xlu0 %261  ;;  %v275_v53 = vpop.permute.xlu1 %274 }
  0xb1   :  { %v264_v54 = vsel %vm83_vm6, %v260_v48, %v262_v52  ;;  %v280_v55 = vsel %vm105_vm4, %v275_v53, %v277_v36 }
  0xb2   :  { %268 = vst [vmem:[#allocation4 + $0x18] sm:$0xf0] %v264_v54  ;;  %v284_v56 = vsel %vm1631_vm7, %v280_v55, 0.0 }
  0xb3   :  { %286 = vst [vmem:[#allocation4 + $0x30] sm:$0xf] %v284_v56 }
  0xb4   :  { %v178_v57 = vpop.permute.xlu0 %177  ;;  %v201_v58 = vpop.permute.xlu1 %200 }
  0xb5   :  { %v184_v59 = vsel %vm183_vm9, %v178_v57, %v180_v40 }
  0xb6   :  { %v188_v60 = vsel %vm1603_vm1, %v184_v59, 0.0 }
  0xb7   :  { %190 = vst [vmem:[#allocation4 + $0x60] sm:$0xf] %v188_v60 }
  0xb8   :  { %v203_v61 = vpop.permute.xlu0 %202  ;;  %v258_v62 = vpop.permute.xlu1 %257 }
  0xb9   :  { %v206_v63 = vsel %vm204_vm10, %v201_v58, %v203_v61  ;;  %v263_v1 = vsel %vm83_vm6, %v258_v62, %v260_v48  ;;  %v404_v3 = vld [vmem:[#allocation4 + $0x18] sm:$0xff]  ;;  %v400_v62 = vld [vmem:[%s1914_s1] sm:$0xff] }
  0xba   :  { %210 = vst [vmem:[#allocation4 + $0x68] sm:$0xf0] %v206_v63  ;;  %267 = vst [vmem:[#allocation4 + $0x10] sm:$0xf0] %v263_v1  ;;  %v1248_v5 = vpack.c.bf16 %v408_v4, %v404_v3  ;;  %v407_v20 = vld [vmem:[#allocation4 + $0x30] sm:$0xff] }
  0xbc   :  { %v327_v7 = vpop.permute.xlu0 %326  ;;  %1249 = vmatprep.subr.bf16.mxu1 %v1248_v5  ;;  %v199_v8 = vpop.permute.xlu1 %198 }
  0xbd   :  { %v331_v9 = vsel %vm157_vm8, %v327_v7, %v1319_v6  ;;  %v205_v10 = vsel %vm204_vm10, %v199_v8, %v201_v58 }
  0xbe   :  { %v335_v11 = vsel %vm1617_vm5, %v331_v9, 0.0  ;;  %209 = vst [vmem:[#allocation4 + $0x60] sm:$0xf0] %v205_v10 }
  0xbf   :  { %v339_v13 = vrot.slane %v335_v11, 4 }
  0xc0   :  { %v325_v14 = vpop.permute.xlu0 %324  ;;  %v352_v15 = vpop.permute.xlu1 %351 }
  0xc1   :  { %343 = vst [vmem:[#allocation4 + $0x58] sm:$0xf0] %v339_v13  ;;  %v330_v18 = vsel %vm157_vm8, %v325_v14, %v327_v7  ;;  %v356_v16 = vsel %vm183_vm9, %v352_v15, %v1324_v12  ;;  %v403_v19 = vld [vmem:[#allocation4 + $0x10] sm:$0xff]  ;;  %v414_v21 = vld [vmem:[#allocation4 + $0x68] sm:$0xff] }
  0xc2   :  { %v334_v22 = vsel %vm1631_vm7, %v330_v18, 0.0  ;;  %v360_v23 = vsel %vm1607_vm2, %v356_v16, 0.0  ;;  %v1250_v24 = vpack.c.bf16 %v407_v20, %v403_v19  ;;  %v1244_v25 = vpack.c.bf16 %v414_v21, %v410_v17 }
  0xc3   :  { %v338_v26 = vrot.slane %v334_v22, 4  ;;  %362 = vst [vmem:[#allocation4 + $0x78] sm:$0xf] %v360_v23 }
  0xc4   :  { %v350_v27 = vpop.permute.xlu0 %349  ;;  %1251 = vmatpush1.bf16.msra.mxu1 %v1250_v24  ;;  %v372_v28 = vpop.permute.xlu1 %371  ;;  %1245 = vmatprep.subr.bf16.mxu0 %v1244_v25 }
  0xc5   :  { %342 = vst [vmem:[#allocation4 + $0x50] sm:$0xf0] %v338_v26  ;;  %v355_v29 = vsel %vm183_vm9, %v350_v27, %v352_v15  ;;  %v413_v31 = vld [vmem:[#allocation4 + $0x60] sm:$0xff] }
  0xc6   :  { %v359_v32 = vsel %vm1603_vm1, %v355_v29, 0.0  ;;  %v1246_v33 = vpack.c.bf16 %v413_v31, %v409_v30  ;;  %v605_v30 = vld [vmem:[%s1915_s3] sm:$0xff] }
  0xc7   :  { %361 = vst [vmem:[#allocation4 + $0x70] sm:$0xf] %v359_v32 }
  0xc8   :  { %v374_v34 = vpop.permute.xlu0 %373  ;;  %v370_v35 = vpop.permute.xlu1 %369  ;;  %1247 = vmatpush1.bf16.msra.mxu0 %v1246_v33  ;;  %v412_v46 = vld [vmem:[#allocation4 + $0x58] sm:$0xff]  ;;  %v609_v33 = vld [vmem:[%s1916_s4] sm:$0xff] }
  0xc9   :  { %v376_v36 = vsel %vm204_vm10, %v372_v28, %v374_v34  ;;  %v375_v37 = vsel %vm204_vm10, %v370_v35, %v372_v28 }
  0xca   :  { %380 = vst [vmem:[#allocation4 + $0x78] sm:$0xf0] %v376_v36  ;;  %379 = vst [vmem:[#allocation4 + $0x70] sm:$0xf0] %v375_v37 }
  0xcc   :  { %v219_v38 = vpop.permute.xlu0 %218  ;;  %v221_v39 = vpop.permute.xlu1 %220  ;;  %v411_v49 = vld [vmem:[#allocation4 + $0x50] sm:$0xff] }
  0xcd   :  { %v224_v40 = vsel %vm222_vm11, %v219_v38, %v221_v39 }
  0xce   :  { %v228_v41 = vsel %vm1617_vm5, %v224_v40, 0.0 }
  0xcf   :  { %230 = vst [vmem:[#allocation4 + $0x88] sm:$0xf] %v228_v41 }
  0xd0   :  { %v217_v44 = vpop.permute.xlu0 %216  ;;  %v389_v45 = vpop.permute.xlu1 %388 }
  0xd1   :  { %v223_v47 = vsel %vm222_vm11, %v217_v44, %v219_v38  ;;  %v416_v48 = vld [vmem:[#allocation4 + $0x78] sm:$0xff]  ;;  %v415_v51 = vld [vmem:[#allocation4 + $0x70] sm:$0xff] }
  0xd2   :  { %v227_v52 = vsel %vm1631_vm7, %v223_v47, 0.0  ;;  %v1252_v53 = vpack.c.bf16 %v416_v48, %v412_v46  ;;  %v1254_v54 = vpack.c.bf16 %v415_v51, %v411_v49 }
  0xd3   :  { %229 = vst [vmem:[#allocation4 + $0x80] sm:$0xf] %v227_v52 }
  0xd4   :  { %v391_v55 = vpop.permute.xlu0 %390  ;;  %v387_v56 = vpop.permute.xlu1 %386  ;;  %1253 = vmatprep.subr.bf16.mxu1 %v1252_v53 }
  0xd5   :  { %v393_v57 = vsel %vm222_vm11, %v389_v45, %v391_v55  ;;  %v392_v58 = vsel %vm222_vm11, %v387_v56, %v389_v45  ;;  %1255 = vmatpush1.bf16.msra.mxu1 %v1254_v54 }
  0xd6   :  { %v397_v59 = vsel %vm1617_vm5, %v393_v57, 0.0  ;;  %v396_v60 = vsel %vm1631_vm7, %v392_v58, 0.0  ;;  %v418_v61 = vld [vmem:[#allocation4 + $0x88] sm:$0xf]  ;;  %v997_v58 = vld [vmem:[%s1917_s6] sm:$0xff] }
  0xd7   :  { %399 = vst [vmem:[#allocation4 + $0x98] sm:$0xf] %v397_v59  ;;  %398 = vst [vmem:[#allocation4 + $0x90] sm:$0xf] %v396_v60  ;;  %1206 = vmatprep.subr.msk.mxu0 %vm431_vm12, %v418_v61 }
  0xda   :  { %v417_v63 = vld [vmem:[#allocation4 + $0x80] sm:$0xf] }
  0xdb   :  { %1207 = vmatpush1.msk.msra.mxu0 %vm431_vm12, %v417_v63 }
  0xdc   :  { %1208 = vmatmul.mubr.msk.f32.vlgmr.msra.gmra.mrb[0].mxu0 %vm427_vm13, %v400_v62 }
  0xdd   :  { %1071 = vmatprep.mubr.f32.mxu0 %v1447_v2 }
  0xde   :  { %v420_v1 = vld [vmem:[#allocation4 + $0x98] sm:$0xf]  ;;  %v419_v3 = vld [vmem:[#allocation4 + $0x90] sm:$0xf] }
  0xdf   :  { %1209 = vmatprep.subr.msk.mxu1 %vm431_vm12, %v420_v1 }
  0xe0   :  { %1210 = vmatpush1.msk.msra.mxu1 %vm431_vm12, %v419_v3  ;;  %vm1790_vm12 = vmpackc.low %vm1457_vm14, %vm1603_vm1 }
  0xe1   :  { %1211 = vmatmul.mubr.msk.f32.vlgmr.msra.gmra.mrb[0].mxu1 %vm427_vm13, %v400_v62  ;;  %vm1826_vm13 = vmpackc.low %vm1617_vm5, %vm1457_vm14 }
  0xe2   :  { %1142 = vmatprep.mubr.f32.mxu1 %v1447_v2 }
  0xe5   :  { %v425_v4 = vpop.permute.xlu0 %424 }
 0x1af   :  { %v510_v5 = vpop.f32.mrb[0].mxu0 }
 0x1b0   :  { %v511_v6 = vadd.f32 %v510_v5, %v425_v4  ;;  %v512_v7 = vpop.f32.mrb[1].mxu0 }
 0x1b1   :  { %v513_v8 = vadd.f32 %v512_v7, %v425_v4 }
 0x1b2   :  { %v591_v9 = vmul.f32 %v511_v6, %v511_v6 }
 0x1b3   :  { %v586_v10 = vadd.f32 %v513_v8, %v511_v6  ;;  %v592_v11 = vmul.f32 %v513_v8, %v513_v8 }
 0x1b4   :  { %v581_v12 = vpop.f32.mrb[0].mxu1 }
 0x1b5   :  { %v582_v13 = vadd.f32 %v581_v12, %v425_v4  ;;  %v583_v14 = vpop.f32.mrb[1].mxu1  ;;  %v595_v15 = vadd.f32 %v592_v11, %v591_v9 }
 0x1b6   :  { %v584_v17 = vadd.f32 %v583_v14, %v425_v4 }
 0x1b7   :  { %v593_v18 = vmul.f32 %v582_v13, %v582_v13  ;;  %v587_v16 = vadd.f32 %v586_v10, %v582_v13 }
 0x1b8   :  { %v594_v19 = vmul.f32 %v584_v17, %v584_v17 }
 0x1b9   :  { %v588_v20 = vadd.f32 %v587_v16, %v584_v17  ;;  %v596_v21 = vadd.f32 %v595_v15, %v593_v18 }
 0x1bb   :  { %589 = vadd.xlane.f32.xlu1 %v588_v20  ;;  %v597_v22 = vadd.f32 %v596_v21, %v594_v19 }
 0x1bd   :  { %598 = vadd.xlane.f32.xlu0 %v597_v22 }
 0x248   :  { %v590_v23 = vpop.xlane.xlu1 %589 }
 0x249   :  { %v601_v24 = vmul.f32 0.001953125, %v590_v23 }
 0x24a   :  { %v599_v25 = vpop.xlane.xlu0 %598 }
 0x24b   :  { %v603_v26 = vmul.f32 %v601_v24, %v601_v24  ;;  %v602_v27 = vmul.f32 0.001953125, %v599_v25 }
 0x24d   :  { %v604_v28 = vsub.f32 %v602_v27, %v603_v26 }
 0x24f   :  { %v606_v29 = vadd.f32 1e-05, %v604_v28 }
 0x251   :  { %1443 = vrsqrt.f32 %v606_v29 }
 0x25b   :  { %v1444_v31 = vpop.eup %1443 }
 0x25c   :  { %v608_v32 = vmul.f32 %v1444_v31, %v605_v30 }
 0x25e   :  { %614 = vperm.xlu1 %1326, %v608_v32   ;;  %v610_v34 = vmul.f32 %v608_v32, %v601_v24 }
 0x260   :  { %v611_v35 = vsub.f32 %v609_v33, %v610_v34 }
 0x262   :  { %623 = vperm.xlu0 %1325, %v611_v35  }
 0x266   :  { %788 = vrot.lane.b32.xlu0 %v1447_v2, %s1455_s19 }
 0x2dd   :  { %v615_v36 = vpop.permute.xlu1 %614 }
 0x2de   :  { %v617_v37 = vmul.f32 %v615_v36, %v511_v6  ;;  %v618_v38 = vmul.f32 %v615_v36, %v513_v8  ;;  %v619_v39 = vmul.f32 %v615_v36, %v582_v13  ;;  %v620_v40 = vmul.f32 %v615_v36, %v584_v17 }
 0x2e1   :  { %v624_v41 = vpop.permute.xlu0 %623 }
 0x2e2   :  { %v626_v44 = vadd.f32 %v624_v41, %v617_v37  ;;  %v627_v45 = vadd.f32 %v624_v41, %v618_v38  ;;  %v628_v46 = vadd.f32 %v624_v41, %v619_v39  ;;  %v629_v47 = vadd.f32 %v624_v41, %v620_v40 }
 0x2e4   :  { %v1720_v48 = vmax.f32 %v626_v44, 0.0  ;;  %v1722_v49 = vmax.f32 %v627_v45, 0.0  ;;  %v1724_v51 = vmax.f32 %v628_v46, 0.0  ;;  %v1726_v52 = vmax.f32 %v629_v47, 0.0 }
 0x2e5   :  { %v1772_v59 = vpop.permute.xlu0 %788 }
 0x2e6   :  { %v1337_v53 = vpack.i.bf16 %v1724_v51, %v1447_v2  ;;  %v1327_v54 = vpack.i.bf16 %v1722_v49, %v1720_v48  ;;  %v1347_v55 = vpack.i.bf16 %v1447_v2, %v1726_v52  ;;  %v1387_v56 = vpack.i.bf16 %v1447_v2, %v1722_v49 }
 0x2e7   :  { %v1392_v57 = vpack.i.bf16 %v1726_v52, %v1720_v48 }
 0x2e8   :  { %1338 = vrot.lane.b32.xlu0 %v1337_v53, %s1449_s13  ;;  %1328 = vrot.lane.b32.xlu1 %v1327_v54, %s1449_s13 }
 0x2ec   :  { %1348 = vrot.lane.b32.xlu0 %v1347_v55, %s1449_s13  ;;  %1333 = vrot.lane.b32.xlu1 %v1327_v54, %s1451_s15 }
 0x2f0   :  { %1358 = vrot.lane.b32.xlu0 %v1327_v54, %s1450_s14  ;;  %1343 = vrot.lane.b32.xlu1 %v1337_v53, %s1451_s15 }
 0x2f4   :  { %1368 = vrot.lane.b32.xlu0 %v1337_v53, %s1450_s14  ;;  %1353 = vrot.lane.b32.xlu1 %v1347_v55, %s1451_s15 }
 0x2f8   :  { %1378 = vrot.lane.b32.xlu0 %v1347_v55, %s1450_s14  ;;  %1363 = vrot.lane.b32.xlu1 %v1327_v54, %s1448_s0 }
 0x2fc   :  { %1388 = vrot.lane.b32.xlu0 %v1387_v56, %s1452_s16  ;;  %1373 = vrot.lane.b32.xlu1 %v1337_v53, %s1448_s0 }
 0x300   :  { %1398 = vrot.lane.b32.xlu0 %v1337_v53, %s1452_s16  ;;  %1383 = vrot.lane.b32.xlu1 %v1347_v55, %s1448_s0 }
 0x304   :  { %1408 = vrot.lane.b32.xlu0 %v1387_v56, %s1454_s18  ;;  %1393 = vrot.lane.b32.xlu1 %v1392_v57, %s1452_s16 }
 0x308   :  { %1418 = vrot.lane.b32.xlu0 %v1392_v57, %s1454_s18  ;;  %1403 = vrot.lane.b32.xlu1 %v1387_v56, %s1453_s17 }
 0x30c   :  { %1428 = vrot.lane.b32.xlu0 %v1337_v53, %s1454_s18  ;;  %1413 = vrot.lane.b32.xlu1 %v1392_v57, %s1453_s17 }
 0x310   :  { %948 = vrot.lane.b32.xlu0 %v1726_v52, %s1455_s19  ;;  %1423 = vrot.lane.b32.xlu1 %v1337_v53, %s1453_s17 }
 0x314   :  { %946 = vrot.lane.b32.xlu0 %v1724_v51, %s1455_s19  ;;  %786 = vrot.lane.b32.xlu1 %v1722_v49, %s1455_s19 }
 0x318   :  { %784 = vrot.lane.b32.xlu1 %v1720_v48, %s1455_s19 }
 0x31c   :  { %950 = vrot.lane.b32.xlu1 %v1447_v2, %s1455_s19 }
 0x320   :  { %1000 = vperm.xlu1 %1326, %v997_v58  }
 0x35a   :  { %v1329_v60 = vpop.permute.xlu1 %1328  ;;  %v1339_v61 = vpop.permute.xlu0 %1338 }
 0x35b   :  { %v1331_v62 = vunpack.i.h.bf16 %v1329_v60  ;;  %v1330_v63 = vunpack.i.l.bf16 %v1329_v60  ;;  %v1340_v7 = vunpack.i.l.bf16 %v1339_v61  ;;  %v1341_v16 = vunpack.i.h.bf16 %v1339_v61 }
 0x35d   :  { %v651_v6 = vsel %vm62_vm0, %v1330_v63, %v1331_v62  ;;  %v650_v15 = vsel %vm62_vm0, %v1340_v7, %v1330_v63 }
 0x35e   :  { %v1334_v1 = vpop.permute.xlu1 %1333  ;;  %v1349_v3 = vpop.permute.xlu0 %1348 }
 0x35f   :  { %v1336_v4 = vunpack.i.h.bf16 %v1334_v1  ;;  %v1335_v5 = vunpack.i.l.bf16 %v1334_v1  ;;  %v1351_v13 = vunpack.i.h.bf16 %v1349_v3  ;;  %v1350_v14 = vunpack.i.l.bf16 %v1349_v3 }
 0x361   :  { %v671_v2 = vsel %vm83_vm6, %v1335_v5, %v1336_v4  ;;  %v812_v25 = vsel %vm62_vm0, %v1351_v13, %v1341_v16  ;;  %v813_v26 = vsel %vm62_vm0, %v1341_v16, %v1350_v14  ;;  %vm1263_vm0 = vmpackc.low %vm1607_vm2, %vm1617_vm5 }
 0x362   :  { %v1256_v9 = vpack.c.bf16 %v671_v2, %v651_v6  ;;  %v1344_v10 = vpop.permute.xlu1 %1343  ;;  %v1359_v11 = vpop.permute.xlu0 %1358 }
 0x363   :  { %v1345_v12 = vunpack.i.l.bf16 %v1344_v10  ;;  %v1346_v22 = vunpack.i.h.bf16 %v1344_v10  ;;  %v1361_v27 = vunpack.i.h.bf16 %v1359_v11  ;;  %v1360_v28 = vunpack.i.l.bf16 %v1359_v11 }
 0x364   :  { %1258 = vmatprep.subr.msk.bf16.mxu0 %vm1779_vm15, %v1256_v9 }
 0x365   :  { %v670_v17 = vsel %vm83_vm6, %v1345_v12, %v1335_v5  ;;  %v689_v38 = vsel %vm105_vm4, %v1360_v28, %v1361_v27 }
 0x366   :  { %v1259_v19 = vpack.c.bf16 %v670_v17, %v650_v15  ;;  %v1354_v20 = vpop.permute.xlu1 %1353  ;;  %v1369_v21 = vpop.permute.xlu0 %1368 }
 0x367   :  { %v1356_v23 = vunpack.i.h.bf16 %v1354_v20  ;;  %v1355_v24 = vunpack.i.l.bf16 %v1354_v20  ;;  %v1370_v37 = vunpack.i.l.bf16 %v1369_v21  ;;  %v1371_v1 = vunpack.i.h.bf16 %v1369_v21 }
 0x368   :  { %1261 = vmatpush1.bf16.msk.msra.mxu0 %vm1790_vm12, %v1259_v19 }
 0x369   :  { %v832_v29 = vsel %vm83_vm6, %v1356_v23, %v1346_v22  ;;  %v833_v30 = vsel %vm83_vm6, %v1346_v22, %v1355_v24  ;;  %v688_v53 = vsel %vm105_vm4, %v1370_v37, %v1360_v28  ;;  %vm1266_vm6 = vmpackc.low %vm1603_vm1, %vm1631_vm7  ;;  %vm1003_vm1 = vcmask 588800  }
 0x36a   :  { %v1280_v31 = vpack.c.bf16 %v833_v30, %v813_v26  ;;  %v1283_v32 = vpack.c.bf16 %v832_v29, %v812_v25  ;;  %v1364_v33 = vpop.permute.xlu1 %1363  ;;  %v1379_v34 = vpop.permute.xlu0 %1378 }
 0x36b   :  { %v1366_v35 = vunpack.i.h.bf16 %v1364_v33  ;;  %v1365_v36 = vunpack.i.l.bf16 %v1364_v33  ;;  %v1381_v54 = vunpack.i.h.bf16 %v1379_v34  ;;  %v1380_v55 = vunpack.i.l.bf16 %v1379_v34 }
 0x36c   :  { %1282 = vmatprep.subr.msk.bf16.mxu1 %vm1779_vm15, %v1280_v31 }
 0x36d   :  { %v709_v39 = vsel %vm125_vm3, %v1365_v36, %v1366_v35  ;;  %1285 = vmatpush1.bf16.msk.msra.mxu1 %vm1790_vm12, %v1283_v32  ;;  %v851_v6 = vsel %vm105_vm4, %v1371_v1, %v1380_v55 }
 0x36e   :  { %v1262_v40 = vpack.c.bf16 %v709_v39, %v689_v38  ;;  %v1374_v41 = vpop.permute.xlu1 %1373  ;;  %v1389_v44 = vpop.permute.xlu0 %1388 }
 0x36f   :  { %v1375_v45 = vunpack.i.l.bf16 %v1374_v41  ;;  %v1391_v46 = vunpack.i.h.bf16 %v1389_v44  ;;  %v1390_v47 = vunpack.i.l.bf16 %v1389_v44  ;;  %v1376_v3 = vunpack.i.h.bf16 %v1374_v41 }
 0x370   :  { %1264 = vmatprep.subr.msk.bf16.mxu0 %vm1263_vm0, %v1262_v40 }
 0x371   :  { %v708_v56 = vsel %vm125_vm3, %v1375_v45, %v1365_v36  ;;  %v733_v57 = vsel %vm157_vm8, %v1390_v47, %v1391_v46 }
 0x372   :  { %v1265_v58 = vpack.c.bf16 %v708_v56, %v688_v53  ;;  %v1268_v60 = vpack.c.bf16 %v733_v57, %v1722_v49  ;;  %v1384_v61 = vpop.permute.xlu1 %1383  ;;  %v1399_v62 = vpop.permute.xlu0 %1398  ;;  %v850_v49 = vsel %vm105_vm4, %v1381_v54, %v1371_v1 }
 0x373   :  { %v1386_v4 = vunpack.i.h.bf16 %v1384_v61  ;;  %v1385_v5 = vunpack.i.l.bf16 %v1384_v61  ;;  %v1401_v13 = vunpack.i.h.bf16 %v1399_v62  ;;  %v1400_v14 = vunpack.i.l.bf16 %v1399_v62 }
 0x374   :  { %1267 = vmatpush1.bf16.msk.msra.mxu0 %vm1266_vm6, %v1265_v58 }
 0x375   :  { %v870_v7 = vsel %vm125_vm3, %v1386_v4, %v1376_v3  ;;  %v871_v2 = vsel %vm125_vm3, %v1376_v3, %v1385_v5  ;;  %1270 = vmatprep.subr.msk.bf16.mxu0 %vm1826_vm13, %v1268_v60  ;;  %vm1272_vm3 = vmpackc.low %vm1631_vm7, %vm1457_vm14  ;;  %v960_v60 = vld [vmem:[%s1918_s5] sm:$0xff] }
 0x376   :  { %v1286_v9 = vpack.c.bf16 %v871_v2, %v851_v6  ;;  %v1289_v10 = vpack.c.bf16 %v870_v7, %v850_v49  ;;  %v1394_v11 = vpop.permute.xlu1 %1393  ;;  %v1409_v12 = vpop.permute.xlu0 %1408 }
 0x377   :  { %v1396_v15 = vunpack.i.h.bf16 %v1394_v11  ;;  %v1395_v17 = vunpack.i.l.bf16 %v1394_v11  ;;  %v1411_v16 = vunpack.i.h.bf16 %v1409_v12  ;;  %v1410_v22 = vunpack.i.l.bf16 %v1409_v12 }
 0x378   :  { %1288 = vmatprep.subr.msk.bf16.mxu1 %vm1263_vm0, %v1286_v9 }
 0x379   :  { %v732_v19 = vsel %vm157_vm8, %v1395_v17, %v1390_v47  ;;  %v894_v20 = vsel %vm157_vm8, %v1401_v13, %v1396_v15  ;;  %v895_v21 = vsel %vm157_vm8, %v1396_v15, %v1400_v14  ;;  %1291 = vmatpush1.bf16.msk.msra.mxu1 %vm1266_vm6, %v1289_v10  ;;  %v773_v42 = vsel %vm204_vm10, %v1410_v22, %v1411_v16 }
 0x37a   :  { %v1271_v43 = vpack.c.bf16 %v732_v19, %v1720_v48  ;;  %v1292_v23 = vpack.c.bf16 %v895_v21, %v1726_v52  ;;  %v1295_v24 = vpack.c.bf16 %v894_v20, %v1724_v51  ;;  %v1404_v25 = vpop.permute.xlu1 %1403  ;;  %v1419_v26 = vpop.permute.xlu0 %1418 }
 0x37b   :  { %v1406_v27 = vunpack.i.h.bf16 %v1404_v25  ;;  %v1405_v28 = vunpack.i.l.bf16 %v1404_v25  ;;  %v1420_v30 = vunpack.i.l.bf16 %v1419_v26  ;;  %v1421_v38 = vunpack.i.h.bf16 %v1419_v26 }
 0x37c   :  { %1273 = vmatpush1.bf16.msk.msra.mxu0 %vm1272_vm3, %v1271_v43  ;;  %1294 = vmatprep.subr.msk.bf16.mxu1 %vm1826_vm13, %v1292_v23 }
 0x37d   :  { %v753_v29 = vsel %vm183_vm9, %v1405_v28, %v1406_v27  ;;  %1297 = vmatpush1.bf16.msk.msra.mxu1 %vm1272_vm3, %v1295_v24  ;;  %v772_v51 = vsel %vm204_vm10, %v1420_v30, %v1410_v22  ;;  %v1167_v24 = vld [vmem:[%s1919_s7] sm:$0xff] }
 0x37e   :  { %v1274_v31 = vpack.c.bf16 %v773_v42, %v753_v29  ;;  %v1414_v48 = vpop.permute.xlu1 %1413  ;;  %v1429_v32 = vpop.permute.xlu0 %1428  ;;  %v1171_v27 = vld [vmem:[%s1920_s8] sm:$0xff] }
 0x37f   :  { %v1415_v52 = vunpack.i.l.bf16 %v1414_v48  ;;  %v1431_v34 = vunpack.i.h.bf16 %v1429_v32  ;;  %v1430_v35 = vunpack.i.l.bf16 %v1429_v32  ;;  %v1416_v39 = vunpack.i.h.bf16 %v1414_v48 }
 0x380   :  { %1276 = vmatprep.subr.msk.bf16.mxu0 %vm1779_vm15, %v1274_v31 }
 0x381   :  { %v752_v33 = vsel %vm183_vm9, %v1415_v52, %v1405_v28  ;;  %v934_v44 = vsel %vm204_vm10, %v1431_v34, %v1421_v38  ;;  %v935_v45 = vsel %vm204_vm10, %v1421_v38, %v1430_v35 }
 0x382   :  { %v1277_v36 = vpack.c.bf16 %v772_v51, %v752_v33  ;;  %v1424_v37 = vpop.permute.xlu1 %1423  ;;  %v949_v56 = vpop.permute.xlu0 %948 }
 0x383   :  { %v1426_v40 = vunpack.i.h.bf16 %v1424_v37  ;;  %v1425_v41 = vunpack.i.l.bf16 %v1424_v37 }
 0x384   :  { %1279 = vmatpush1.bf16.msk.msra.mxu0 %vm1790_vm12, %v1277_v36 }
 0x385   :  { %v914_v46 = vsel %vm183_vm9, %v1426_v40, %v1416_v39  ;;  %v915_v47 = vsel %vm183_vm9, %v1416_v39, %v1425_v41 }
 0x386   :  { %v1298_v53 = vpack.c.bf16 %v935_v45, %v915_v47  ;;  %v1301_v54 = vpack.c.bf16 %v934_v44, %v914_v46  ;;  %v787_v55 = vpop.permute.xlu1 %786 }
 0x387   :  { %v791_v57 = vsel %vm222_vm11, %v787_v55, %v1772_v59  ;;  %v947_v59 = vpop.permute.xlu0 %946 }
 0x388   :  { %1226 = vmatprep.subr.msk.mxu0 %vm1617_vm5, %v791_v57  ;;  %1300 = vmatprep.subr.msk.bf16.mxu1 %vm1779_vm15, %v1298_v53  ;;  %v952_v63 = vsel %vm222_vm11, %v947_v59, %v949_v56 }
 0x389   :  { %1303 = vmatpush1.bf16.msk.msra.mxu1 %vm1790_vm12, %v1301_v54 }
 0x38a   :  { %v785_v58 = vpop.permute.xlu1 %784 }
 0x38b   :  { %v790_v61 = vsel %vm222_vm11, %v785_v58, %v787_v55 }
 0x38c   :  { %1227 = vmatpush1.msk.msra.mxu0 %vm1631_vm7, %v790_v61 }
 0x38d   :  { %1212 = vmatmul.mubr.msk.f32.vlgmr.msra.gmra.mrb[2].mxu0 %vm1003_vm1, %v960_v60 }
 0x38e   :  { %v951_v62 = vpop.permute.xlu1 %950 }
 0x38f   :  { %v953_v8 = vsel %vm222_vm11, %v949_v56, %v951_v62 }
 0x390   :  { %1238 = vmatprep.subr.msk.mxu1 %vm1617_vm5, %v953_v8 }
 0x391   :  { %1239 = vmatpush1.msk.msra.mxu1 %vm1631_vm7, %v952_v63 }
 0x392   :  { %1213 = vmatmul.mubr.msk.f32.vlgmr.msra.gmra.mrb[2].mxu1 %vm1003_vm1, %v960_v60 }
 0x39f   :  { %v1001_v18 = vpop.permute.xlu1 %1000 }
 0x460   :  { %v1073_v1 = vpop.f32.mrb[2].mxu0 }
 0x461   :  { %v1074_v3 = vadd.f32 %v1073_v1, %v1001_v18  ;;  %v1075_v4 = vpop.f32.mrb[3].mxu0 }
 0x462   :  { %v1076_v5 = vadd.f32 %v1075_v4, %v1001_v18 }
 0x463   :  { %v1154_v49 = vmul.f32 %v1074_v3, %v1074_v3 }
 0x464   :  { %v1155_v6 = vmul.f32 %v1076_v5, %v1076_v5  ;;  %v1149_v2 = vadd.f32 %v1076_v5, %v1074_v3 }
 0x465   :  { %v1144_v7 = vpop.f32.mrb[2].mxu1 }
 0x466   :  { %v1145_v9 = vadd.f32 %v1144_v7, %v1001_v18  ;;  %v1146_v10 = vpop.f32.mrb[3].mxu1  ;;  %v1158_v50 = vadd.f32 %v1155_v6, %v1154_v49 }
 0x467   :  { %v1147_v11 = vadd.f32 %v1146_v10, %v1001_v18 }
 0x468   :  { %v1156_v12 = vmul.f32 %v1145_v9, %v1145_v9  ;;  %v1150_v13 = vadd.f32 %v1149_v2, %v1145_v9 }
 0x469   :  { %v1157_v14 = vmul.f32 %v1147_v11, %v1147_v11 }
 0x46a   :  { %v1151_v15 = vadd.f32 %v1150_v13, %v1147_v11  ;;  %v1159_v0 = vadd.f32 %v1158_v50, %v1156_v12 }
 0x46c   :  { %1152 = vadd.xlane.f32.xlu0 %v1151_v15  ;;  %v1160_v17 = vadd.f32 %v1159_v0, %v1157_v14 }
 0x46e   :  { %1161 = vadd.xlane.f32.xlu1 %v1160_v17 }
 0x4f9   :  { %v1153_v16 = vpop.xlane.xlu0 %1152 }
 0x4fa   :  { %v1163_v19 = vmul.f32 0.001953125, %v1153_v16 }
 0x4fb   :  { %v1162_v20 = vpop.xlane.xlu1 %1161 }
 0x4fc   :  { %v1165_v21 = vmul.f32 %v1163_v19, %v1163_v19  ;;  %v1164_v22 = vmul.f32 0.001953125, %v1162_v20 }
 0x4fe   :  { %v1166_v43 = vsub.f32 %v1164_v22, %v1165_v21 }
 0x500   :  { %v1168_v23 = vadd.f32 1e-05, %v1166_v43 }
 0x502   :  { %1445 = vrsqrt.f32 %v1168_v23 }
 0x50c   :  { %v1446_v25 = vpop.eup %1445 }
 0x50d   :  { %v1170_v26 = vmul.f32 %v1446_v25, %v1167_v24 }
 0x50f   :  { %1176 = vperm.xlu0 %1325, %v1170_v26   ;;  %v1172_v28 = vmul.f32 %v1170_v26, %v1163_v19 }
 0x511   :  { %v1173_v42 = vsub.f32 %v1171_v27, %v1172_v28 }
 0x513   :  { %1185 = vperm.xlu1 %1326, %v1173_v42  }
 0x58e   :  { %v1177_v29 = vpop.permute.xlu0 %1176 }
 0x58f   :  { %v1179_v30 = vmul.f32 %v1177_v29, %v1074_v3  ;;  %v1180_v31 = vmul.f32 %v1177_v29, %v1076_v5  ;;  %v1181_v48 = vmul.f32 %v1177_v29, %v1145_v9  ;;  %v1182_v32 = vmul.f32 %v1177_v29, %v1147_v11 }
 0x592   :  { %v1186_v52 = vpop.permute.xlu1 %1185 }
 0x593   :  { %v1188_v51 = vadd.f32 %v1186_v52, %v1179_v30  ;;  %v1189_v33 = vadd.f32 %v1186_v52, %v1180_v31  ;;  %v1190_v34 = vadd.f32 %v1186_v52, %v1181_v48  ;;  %v1191_v35 = vadd.f32 %v1186_v52, %v1182_v32 }
 0x595   :  { %v1192_v36 = vmax.f32 %v1188_v51, 0.0  ;;  %v1193_v37 = vmax.f32 %v1189_v33, 0.0  ;;  %v1194_v38 = vmax.f32 %v1190_v34, 0.0  ;;  %v1195_v39 = vmax.f32 %v1191_v35, 0.0 }
 0x597   :  { %1196 = vst [vmem:[%s1921_s9] sm:$0xff] %v1192_v36  ;;  %1197 = vst [vmem:[%s1921_s9 + $0x8] sm:$0xff] %v1193_v37 }
 0x598   :  { %1214 = vst [vmem:[%s1921_s9 + $0x10] sm:$0xff] %v1194_v38  ;;  %1215 = vst [vmem:[%s1921_s9 + $0x18] sm:$0xff] %v1195_v39 }

</bundles_post_ra>
